<compile_context>
chip_gen: v7x
topology: tpu7x:2x2x1
jax: 0.10.0
libtpu: 0.0.40
codegen_flags: <defaults>
</compile_context>

<pallas_src>
import functools
import math

import jax
import jax.numpy as jnp
import numpy as np
from jax.experimental import pallas as pl
from jax.experimental.pallas import tpu as pltpu

LN_EPS = 1e-5


def _layernorm(v, eps=LN_EPS):
    """LayerNorm over the last axis, elementwise_affine=False (f32 math)."""
    mu = jnp.mean(v, axis=-1, keepdims=True)
    var = jnp.mean((v - mu) ** 2, axis=-1, keepdims=True)
    return (v - mu) * jax.lax.rsqrt(var + eps)


def _pick_batch_block(B, S, target_rows=256, max_rows=1024):
    """Largest divisor Bt of B with Bt*S <= max_rows (stop once >= target).

    Packing Bt*S rows per grid step fills the MXU M dimension even when the
    sequence is short. (On v7x, larger B keeps both TensorCores fed via the
    parallel batch-block axis.)
    """
    bt = 1
    for cand in range(1, B + 1):
        if B % cand == 0 and cand * S <= max_rows:
            bt = cand
            if cand * S >= target_rows:
                break
    return bt


def _pick_vocab_tile(V, max_tile=2048):
    """Lane-dense vocab tile (multiple of 128) dividing V, or V if small."""
    if V <= max_tile or V % 128 != 0:
        return V
    vt = max_tile - (max_tile % 128)
    while V % vt != 0:
        vt -= 128
    return vt


# ---------------------------------------------------------------------------
# DecoderBlock kernel: grid = (batch_blocks,); all heads fused per grid step.
# ---------------------------------------------------------------------------
def decoder_block_kernel(x_ref, wqkv_ref, bqkv_ref, wo_ref, bo_ref,
                         w1_ref, b1_ref, w2_ref, b2_ref, o_ref,
                         *, num_heads, d_head, depth_scale):
    Bt, S, D = x_ref.shape
    H, dh = num_heads, d_head
    rows = Bt * S

    # Residual stream in f32; hoisted bf16 operand for the MXU (once per step).
    x = x_ref[...].astype(jnp.float32).reshape(rows, D)
    x_bf = x.astype(jnp.bfloat16)

    # Fused q/k/v projection: one (rows, D) @ (D, 3D) MXU matmul.
    qkv = jnp.dot(x_bf, wqkv_ref[...], preferred_element_type=jnp.float32)
    qkv = qkv + bqkv_ref[...]
    q = qkv[:, 0 * D:1 * D]
    k = qkv[:, 1 * D:2 * D]
    v = qkv[:, 2 * D:3 * D]

    # Causal mask built once per grid step (shared by all heads).
    q_pos = jax.lax.broadcasted_iota(jnp.int32, (S, S), 0)
    k_pos = jax.lax.broadcasted_iota(jnp.int32, (S, S), 1)
    causal = k_pos <= q_pos

    inv_sqrt_dh = 1.0 / math.sqrt(dh)
    ctx_parts = []
    # TODO(synk): for long sequences switch to causal flash-style KV tiling
    # (online softmax, skip tiles above the diagonal) instead of the full
    # (S, S) score matrix; at these shapes everything fits in one grid step.
    for h in range(H):
        sl = slice(h * dh, (h + 1) * dh)
        # QK-LayerNorm per head (elementwise_affine=False); 1/sqrt(dh) folded
        # into q so the (S, S) score matrix is never rescaled on the VPU.
        q_h = (_layernorm(q[:, sl]) * inv_sqrt_dh).reshape(Bt, S, dh)
        k_h = _layernorm(k[:, sl]).reshape(Bt, S, dh)
        v_h = v[:, sl].reshape(Bt, S, dh)

        s = jnp.einsum("bqd,bkd->bqk",
                       q_h.astype(jnp.bfloat16), k_h.astype(jnp.bfloat16),
                       preferred_element_type=jnp.float32)       # (Bt, S, S)
        s = jnp.where(causal, s, -1e30)                          # mask in f32
        s = s - jnp.max(s, axis=-1, keepdims=True)
        p = jnp.exp(s)
        p = p * pl.reciprocal(jnp.sum(p, axis=-1, keepdims=True), approx=True)
        ctx_parts.append(
            jnp.einsum("bqk,bkd->bqd",
                       p.astype(jnp.bfloat16), v_h.astype(jnp.bfloat16),
                       preferred_element_type=jnp.float32).astype(jnp.bfloat16))

    # Concatenate head contexts -> single (rows, D) @ (D, D) output projection
    # (ctx@wo contraction K-dim is D, not d_head).
    ctx = jnp.concatenate(ctx_parts, axis=-1).reshape(rows, D)
    attn = jnp.dot(ctx, wo_ref[...], preferred_element_type=jnp.float32)
    attn = attn + bo_ref[...]

    # Post-norm residuals + FFN (f32 residual math, bf16 MXU operands).
    y1 = _layernorm(x + depth_scale * attn)
    # TODO(synk): for large d_ff tile w1/w2 over an extra "arbitrary" grid axis
    # (and single-buffer the constant-index weight specs) to fit v7x's 64 MiB
    # VMEM; resident FFN weights are fine at these shapes.
    hdn = jnp.maximum(
        jnp.dot(y1.astype(jnp.bfloat16), w1_ref[...],
                preferred_element_type=jnp.float32) + b1_ref[...], 0.0)
    ffo = jnp.dot(hdn.astype(jnp.bfloat16), w2_ref[...],
                  preferred_element_type=jnp.float32) + b2_ref[...]
    out = _layernorm(y1 + depth_scale * ffo)
    o_ref[...] = out.reshape(Bt, S, D).astype(o_ref.dtype)


def decoder_block(x, p, *, num_heads, depth_scale, batch_block):
    B, S, D = x.shape
    d_ff = p["w1"].shape[1]
    Bt = batch_block
    nb = B // Bt

    # Host-side (XLA) fusion of the QKV weights/biases into single operands.
    wqkv = jnp.concatenate([p["wq"], p["wk"], p["wv"]], axis=1)   # (D, 3D) bf16
    bqkv = jnp.concatenate([p["bq"], p["bk"], p["bv"]], axis=1)   # (1, 3D) f32

    const = lambda shape: pl.BlockSpec(shape, lambda b: (0, 0))
    in_specs = [
        pl.BlockSpec((Bt, S, D), lambda b: (b, 0, 0)),   # x
        const((D, 3 * D)),                               # wqkv
        const((1, 3 * D)),                               # bqkv
        const((D, D)),                                   # wo
        const((1, D)),                                   # bo
        const((D, d_ff)),                                # w1
        const((1, d_ff)),                                # b1
        const((d_ff, D)),                                # w2
        const((1, D)),                                   # b2
    ]

    flops = int(B * S * (8 * D * D + 4 * D * d_ff) + 4 * B * S * S * D)
    transcendentals = int(B * num_heads * S * S + 8 * B * S)
    # Constant weight index maps => weights DMA'd once per kernel launch;
    # activations move in bf16 (2 bytes) in and out.
    bytes_accessed = int((4 * D * D + 2 * D * d_ff) * 2
                         + (5 * D + d_ff) * 4
                         + 2 * B * S * D * 2)

    kernel = functools.partial(decoder_block_kernel, num_heads=num_heads,
                               d_head=D // num_heads, depth_scale=depth_scale)
    return pl.pallas_call(
        kernel,
        out_shape=jax.ShapeDtypeStruct((B, S, D), x.dtype),
        grid_spec=pltpu.PrefetchScalarGridSpec(
            num_scalar_prefetch=0,
            grid=(nb,),
            in_specs=in_specs,
            out_specs=pl.BlockSpec((Bt, S, D), lambda b: (b, 0, 0)),
        ),
        compiler_params=pltpu.CompilerParams(
            dimension_semantics=("parallel",),
            vmem_limit_bytes=64 * 1024 * 1024,
        ),
        cost_estimate=pl.CostEstimate(flops=flops,
                                      transcendentals=transcendentals,
                                      bytes_accessed=bytes_accessed),
    )(x, wqkv, bqkv, p["wo"], p["bo"], p["w1"], p["b1"], p["w2"], p["b2"])


# ---------------------------------------------------------------------------
# Final LayerNorm + output projection + log_softmax, vocab-tiled two-pass LSE.
# grid = (batch_blocks, 2 passes, vocab_tiles); vocab/pass axes are reductions.
# ---------------------------------------------------------------------------
def output_head_kernel(x_ref, w_ref, b_ref, o_ref, m_ref, l_ref):
    phase = pl.program_id(1)
    vi = pl.program_id(2)
    Bt, S, D = x_ref.shape
    rows = Bt * S

    xn = _layernorm(x_ref[...].astype(jnp.float32).reshape(rows, D))
    logits = jnp.dot(xn.astype(jnp.bfloat16), w_ref[...],
                     preferred_element_type=jnp.float32) + b_ref[...]  # (rows, Vt)

    @pl.when(jnp.logical_and(phase == 0, vi == 0))
    def _init():
        m_ref[...] = jnp.full_like(m_ref, -jnp.inf)
        l_ref[...] = jnp.zeros_like(l_ref)

    @pl.when(phase == 0)
    def _accumulate():                 # pass 1: online max / sum-exp over vocab
        m_prev = m_ref[...]
        m_new = jnp.maximum(m_prev, jnp.max(logits, axis=-1, keepdims=True))
        l_ref[...] = (l_ref[...] * jnp.exp(m_prev - m_new)
                      + jnp.sum(jnp.exp(logits - m_new), axis=-1, keepdims=True))
        m_ref[...] = m_new

    @pl.when(phase == 1)
    def _write():                      # pass 2: normalized log-probabilities
        lse = m_ref[...] + jnp.log(l_ref[...])
        o_ref[...] = (logits - lse).reshape(Bt, S, o_ref.shape[2]).astype(o_ref.dtype)


def output_head(x, w_out, b_out, *, batch_block):
    B, S, D = x.shape
    V = w_out.shape[1]
    Bt = batch_block
    nb = B // Bt
    Vt = _pick_vocab_tile(V)
    nv = V // Vt

    flops = int(2 * 2 * B * S * D * V)           # logits matmul re-run in pass 2
    bytes_accessed = int(2 * nb * D * V * 2 + 2 * V * 4
                         + 2 * B * S * D * 2 + 2 * B * S * V * 4)
    return pl.pallas_call(
        output_head_kernel,
        out_shape=jax.ShapeDtypeStruct((B, S, V), jnp.float32),
        grid_spec=pltpu.PrefetchScalarGridSpec(
            num_scalar_prefetch=0,
            grid=(nb, 2, nv),
            in_specs=[
                pl.BlockSpec((Bt, S, D), lambda b, ph, v: (b, 0, 0)),
                pl.BlockSpec((D, Vt), lambda b, ph, v: (0, v)),
                pl.BlockSpec((1, Vt), lambda b, ph, v: (0, v)),
            ],
            out_specs=pl.BlockSpec((Bt, S, Vt), lambda b, ph, v: (b, 0, v)),
            scratch_shapes=[pltpu.VMEM((Bt * S, 1), jnp.float32),   # running max
                            pltpu.VMEM((Bt * S, 1), jnp.float32)],  # running sumexp
        ),
        compiler_params=pltpu.CompilerParams(
            dimension_semantics=("parallel", "arbitrary", "arbitrary"),
            vmem_limit_bytes=64 * 1024 * 1024,
        ),
        cost_estimate=pl.CostEstimate(flops=flops,
                                      transcendentals=int(2 * B * S * V),
                                      bytes_accessed=bytes_accessed),
    )(x, w_out, b_out)


# ---------------------------------------------------------------------------
# Full model wrapper.
# ---------------------------------------------------------------------------
def transformer_forward(tokens, params, *, num_heads, depthmult=1.0):
    B, S = tokens.shape
    # TODO(synk): token-embedding gather + positional add left to XLA; a Pallas
    # version needs a manual DMA row-gather which is not worth it at this size.
    x = jnp.take(params["emb"], tokens, axis=0) + params["pos"][None, :S, :]
    x = x.astype(jnp.bfloat16)                 # bf16 residual stream between layers
    depth_scale = 1.0 / math.sqrt(depthmult)   # use_forward_pass_rootL=True
    bt = _pick_batch_block(B, S)
    for lp in params["layers"]:
        x = decoder_block(x, lp, num_heads=num_heads, depth_scale=depth_scale,
                          batch_block=bt)
    return output_head(x, params["wout"], params["bout"], batch_block=bt)


# ---------------------------------------------------------------------------
# Parameter init mirroring the PyTorch module (weights stored as (in, out)).
# ---------------------------------------------------------------------------
def make_pos_encoding(d_model, max_len=1024):
    position = np.arange(max_len, dtype=np.float32)[:, None]
    div_term = np.exp(np.arange(0, d_model, 2, dtype=np.float32)
                      * (-math.log(10000.0) / d_model))
    pe = np.zeros((max_len, d_model), np.float32)
    pe[:, 0::2] = np.sin(position * div_term)
    pe[:, 1::2] = np.cos(position * div_term)
    return jnp.asarray(pe)


def make_params(key, *, vocab_size, d_model, num_heads, num_layers, d_ff,
                init_scale=1.0, widthmult=1.0, depthmult=1.0,
                use_forward_pass_rootL=True):
    del num_heads  # head count only affects the forward split, not the init
    keys = jax.random.split(key, num_layers + 2)

    def kaiming(k, fan_in, shape, gain=1.0):
        return (gain / math.sqrt(fan_in)) * jax.random.normal(k, shape, jnp.float32)

    depth_fac = 1.0 if use_forward_pass_rootL else 1.0 / math.sqrt(depthmult)

    layers = []
    for l in range(num_layers):
        ks = jax.random.split(keys[l], 6)
        w = {
            "wq": kaiming(ks[0], d_model, (d_model, d_model)) * init_scale,
            "wk": kaiming(ks[1], d_model, (d_model, d_model)) * init_scale,
            "wv": kaiming(ks[2], d_model, (d_model, d_model)) * init_scale,
            "wo": kaiming(ks[3], d_model, (d_model, d_model))
                  * (init_scale / math.sqrt(widthmult) * depth_fac),
            "w1": kaiming(ks[4], d_model, (d_model, d_ff)) * init_scale,
            "w2": kaiming(ks[5], d_ff, (d_ff, d_model), gain=math.sqrt(2.0))
                  * (init_scale * depth_fac),
        }
        lp = {k: v.astype(jnp.bfloat16) for k, v in w.items()}   # bf16 MXU weights
        for name, dim in [("bq", d_model), ("bk", d_model), ("bv", d_model),
                          ("bo", d_model), ("b1", d_ff), ("b2", d_model)]:
            lp[name] = jnp.zeros((1, dim), jnp.float32)
        layers.append(lp)

    return {
        "emb": jax.random.normal(keys[num_layers], (vocab_size, d_model), jnp.float32),
        "pos": make_pos_encoding(d_model),
        "wout": kaiming(keys[num_layers + 1], d_model,
                        (d_model, vocab_size)).astype(jnp.bfloat16),
        "bout": jnp.zeros((1, vocab_size), jnp.float32),
        "layers": layers,
    }


# ---------------------------------------------------------------------------
# Pure-JAX f32 reference replicating the PyTorch forward.
# ---------------------------------------------------------------------------
def decoder_block_ref(x, p, *, num_heads, depth_scale):
    B, S, D = x.shape
    H, dh = num_heads, D // num_heads
    f = lambda w: w.astype(jnp.float32)

    q = x @ f(p["wq"]) + p["bq"]
    k = x @ f(p["wk"]) + p["bk"]
    v = x @ f(p["wv"]) + p["bv"]
    q = _layernorm(q.reshape(B, S, H, dh)).transpose(0, 2, 1, 3)
    k = _layernorm(k.reshape(B, S, H, dh)).transpose(0, 2, 1, 3)
    v = v.reshape(B, S, H, dh).transpose(0, 2, 1, 3)

    scores = jnp.einsum("bhqd,bhkd->bhqk", q, k) / math.sqrt(dh)
    mask = jnp.tril(jnp.ones((S, S), bool))
    scores = jnp.where(mask, scores, -jnp.inf)
    w = jax.nn.softmax(scores, axis=-1)
    attn = jnp.einsum("bhqk,bhkd->bhqd", w, v).transpose(0, 2, 1, 3).reshape(B, S, D)
    attn = attn @ f(p["wo"]) + p["bo"]

    y1 = _layernorm(x + depth_scale * attn)
    ff = jnp.maximum(y1 @ f(p["w1"]) + p["b1"], 0.0) @ f(p["w2"]) + p["b2"]
    return _layernorm(y1 + depth_scale * ff)


def transformer_ref(tokens, params, *, num_heads, depthmult=1.0):
    S = tokens.shape[1]
    x = jnp.take(params["emb"], tokens, axis=0) + params["pos"][None, :S, :]
    depth_scale = 1.0 / math.sqrt(depthmult)
    for lp in params["layers"]:
        x = decoder_block_ref(x, lp, num_heads=num_heads, depth_scale=depth_scale)
    xn = _layernorm(x)
    logits = xn @ params["wout"].astype(jnp.float32) + params["bout"]
    return jax.nn.log_softmax(logits, axis=-1)


if __name__ == "__main__":
    VOCAB, D_MODEL, NUM_HEADS, NUM_LAYERS, D_FF = 64, 32, 4, 2, 64
    B, S = 2, 8

    key = jax.random.PRNGKey(0)
    k_tok, k_par = jax.random.split(key)
    tokens = jax.random.randint(k_tok, (B, S), 0, VOCAB, dtype=jnp.int32)
    params = make_params(k_par, vocab_size=VOCAB, d_model=D_MODEL,
                         num_heads=NUM_HEADS, num_layers=NUM_LAYERS, d_ff=D_FF)

    fwd = jax.jit(functools.partial(transformer_forward, num_heads=NUM_HEADS))
    out = jax.block_until_ready(fwd(tokens, params))

    ref = transformer_ref(tokens, params, num_heads=NUM_HEADS)
    np.testing.assert_allclose(np.asarray(out), np.asarray(ref),
                               rtol=5e-2, atol=5e-2)

    print("KERNEL_OK")
</pallas_src>

<mosaic_0001>
module attributes {stable_mosaic.version = 11 : i64} {
  func.func @output_head_kernel(%arg0: i32, %arg1: i32, %arg2: i32, %arg3: memref<2x8x32xbf16, #tpu.memory_space<vmem>>, %arg4: memref<32x64xbf16, #tpu.memory_space<vmem>>, %arg5: memref<1x64xf32, #tpu.memory_space<vmem>>, %arg6: memref<2x8x64xf32, #tpu.memory_space<vmem>>, %arg7: memref<16x1xf32, #tpu.memory_space<vmem>>, %arg8: memref<16x1xf32, #tpu.memory_space<vmem>>) attributes {dimension_semantics = [#tpu.dimension_semantics<parallel>, #tpu.dimension_semantics<arbitrary>, #tpu.dimension_semantics<arbitrary>], iteration_bounds = array<i64: 1, 2, 1>, scalar_prefetch = 0 : i64, scratch_operands = 2 : i64, tpu.core_type = #tpu.core_type<tc>, window_params = [{transform_indices = @transform_0, window_bounds = array<i64: 2, 8, 32>}, {transform_indices = @transform_1, window_bounds = array<i64: 32, 64>}, {transform_indices = @transform_2, window_bounds = array<i64: 1, 64>}, {transform_indices = @transform_3, window_bounds = array<i64: 2, 8, 64>}]} {
    %c0 = arith.constant 0 : index
    %c0_0 = arith.constant 0 : index
    %c0_1 = arith.constant 0 : index
    %0 = vector.load %arg3[%c0, %c0_0, %c0_1] : memref<2x8x32xbf16, #tpu.memory_space<vmem>>, vector<2x8x32xbf16>
    %1 = arith.extf %0 : vector<2x8x32xbf16> to vector<2x8x32xf32>
    %2 = vector.shape_cast %1 : vector<2x8x32xf32> to vector<16x32xf32>
    %cst = arith.constant dense<0.000000e+00> : vector<16xf32>
    %3 = vector.multi_reduction <add>, %2, %cst [1] : vector<16x32xf32> to vector<16xf32>
    %4 = vector.shape_cast %3 : vector<16xf32> to vector<16x1xf32>
    %cst_2 = arith.constant 3.200000e+01 : f32
    %5 = vector.broadcast %cst_2 : f32 to vector<16x1xf32>
    %6 = arith.divf %4, %5 : vector<16x1xf32>
    %7 = vector.broadcast %6 : vector<16x1xf32> to vector<16x32xf32>
    %8 = arith.subf %2, %7 : vector<16x32xf32>
    %9 = arith.mulf %8, %8 : vector<16x32xf32>
    %cst_3 = arith.constant dense<0.000000e+00> : vector<16xf32>
    %10 = vector.multi_reduction <add>, %9, %cst_3 [1] : vector<16x32xf32> to vector<16xf32>
    %11 = vector.shape_cast %10 : vector<16xf32> to vector<16x1xf32>
    %cst_4 = arith.constant 3.200000e+01 : f32
    %12 = vector.broadcast %cst_4 : f32 to vector<16x1xf32>
    %13 = arith.divf %11, %12 : vector<16x1xf32>
    %14 = vector.broadcast %6 : vector<16x1xf32> to vector<16x32xf32>
    %15 = arith.subf %2, %14 : vector<16x32xf32>
    %cst_5 = arith.constant 9.99999974E-6 : f32
    %16 = vector.broadcast %cst_5 : f32 to vector<16x1xf32>
    %17 = arith.addf %13, %16 : vector<16x1xf32>
    %18 = math.rsqrt %17 : vector<16x1xf32>
    %19 = vector.broadcast %18 : vector<16x1xf32> to vector<16x32xf32>
    %20 = arith.mulf %15, %19 : vector<16x32xf32>
    %21 = arith.truncf %20 : vector<16x32xf32> to vector<16x32xbf16>
    %c0_6 = arith.constant 0 : index
    %c0_7 = arith.constant 0 : index
    %22 = vector.load %arg4[%c0_6, %c0_7] : memref<32x64xbf16, #tpu.memory_space<vmem>>, vector<32x64xbf16>
    %cst_8 = arith.constant dense<0.000000e+00> : vector<16x64xf32>
    %23 = tpu.matmul %21, %22, %cst_8 {dimension_numbers = #tpu.dot_dimension_numbers<[1], [0], [0], [1], [0, 0, 1, 1], [], []>} : vector<16x32xbf16>, vector<32x64xbf16>, vector<16x64xf32> -> vector<16x64xf32>
    %c0_9 = arith.constant 0 : index
    %c0_10 = arith.constant 0 : index
    %24 = vector.load %arg5[%c0_9, %c0_10] : memref<1x64xf32, #tpu.memory_space<vmem>>, vector<1x64xf32>
    %25 = vector.broadcast %24 : vector<1x64xf32> to vector<16x64xf32>
    %26 = arith.addf %23, %25 : vector<16x64xf32>
    %c0_i32 = arith.constant 0 : i32
    %27 = arith.cmpi eq, %arg1, %c0_i32 : i32
    %c0_i32_11 = arith.constant 0 : i32
    %28 = arith.cmpi eq, %arg2, %c0_i32_11 : i32
    %29 = arith.andi %27, %28 : i1
    %30 = arith.extui %29 : i1 to i32
    %c0_i32_12 = arith.constant 0 : i32
    %31 = arith.cmpi ne, %30, %c0_i32_12 : i32
    scf.if %31 {
      %cst_16 = arith.constant 0xFF800000 : f32
      %38 = vector.broadcast %cst_16 : f32 to vector<16x1xf32>
      %c0_17 = arith.constant 0 : index
      %c0_18 = arith.constant 0 : index
      %39 = vector.load %arg7[%c0_17, %c0_18] : memref<16x1xf32, #tpu.memory_space<vmem>>, vector<16x1xf32>
      tpu.vector_store %arg7[%c0_17, %c0_18], %38 {strides = array<i32>} : memref<16x1xf32, #tpu.memory_space<vmem>>, vector<16x1xf32>,
      %cst_19 = arith.constant 0.000000e+00 : f32
      %40 = vector.broadcast %cst_19 : f32 to vector<16x1xf32>
      %c0_20 = arith.constant 0 : index
      %c0_21 = arith.constant 0 : index
      %41 = vector.load %arg8[%c0_20, %c0_21] : memref<16x1xf32, #tpu.memory_space<vmem>>, vector<16x1xf32>
      tpu.vector_store %arg8[%c0_20, %c0_21], %40 {strides = array<i32>} : memref<16x1xf32, #tpu.memory_space<vmem>>, vector<16x1xf32>,
    } else {
    }
    %c0_i32_13 = arith.constant 0 : i32
    %32 = arith.cmpi eq, %arg1, %c0_i32_13 : i32
    %33 = arith.extui %32 : i1 to i32
    %c0_i32_14 = arith.constant 0 : i32
    %34 = arith.cmpi ne, %33, %c0_i32_14 : i32
    scf.if %34 {
      %c0_16 = arith.constant 0 : index
      %c0_17 = arith.constant 0 : index
      %38 = vector.load %arg7[%c0_16, %c0_17] : memref<16x1xf32, #tpu.memory_space<vmem>>, vector<16x1xf32>
      %cst_18 = arith.constant dense<0xFF800000> : vector<16xf32>
      %39 = vector.multi_reduction <maximumf>, %26, %cst_18 [1] : vector<16x64xf32> to vector<16xf32>
      %40 = vector.shape_cast %39 : vector<16xf32> to vector<16x1xf32>
      %41 = arith.maximumf %38, %40 : vector<16x1xf32>
      %c0_19 = arith.constant 0 : index
      %c0_20 = arith.constant 0 : index
      %42 = vector.load %arg8[%c0_19, %c0_20] : memref<16x1xf32, #tpu.memory_space<vmem>>, vector<16x1xf32>
      %43 = arith.subf %38, %41 : vector<16x1xf32>
      %44 = math.exp %43 : vector<16x1xf32>
      %45 = arith.mulf %42, %44 : vector<16x1xf32>
      %46 = vector.broadcast %41 : vector<16x1xf32> to vector<16x64xf32>
      %47 = arith.subf %26, %46 : vector<16x64xf32>
      %48 = math.exp %47 : vector<16x64xf32>
      %cst_21 = arith.constant dense<0.000000e+00> : vector<16xf32>
      %49 = vector.multi_reduction <add>, %48, %cst_21 [1] : vector<16x64xf32> to vector<16xf32>
      %50 = vector.shape_cast %49 : vector<16xf32> to vector<16x1xf32>
      %51 = arith.addf %45, %50 : vector<16x1xf32>
      %c0_22 = arith.constant 0 : index
      %c0_23 = arith.constant 0 : index
      %52 = vector.load %arg8[%c0_22, %c0_23] : memref<16x1xf32, #tpu.memory_space<vmem>>, vector<16x1xf32>
      tpu.vector_store %arg8[%c0_22, %c0_23], %51 {strides = array<i32>} : memref<16x1xf32, #tpu.memory_space<vmem>>, vector<16x1xf32>,
      %c0_24 = arith.constant 0 : index
      %c0_25 = arith.constant 0 : index
      %53 = vector.load %arg7[%c0_24, %c0_25] : memref<16x1xf32, #tpu.memory_space<vmem>>, vector<16x1xf32>
      tpu.vector_store %arg7[%c0_24, %c0_25], %41 {strides = array<i32>} : memref<16x1xf32, #tpu.memory_space<vmem>>, vector<16x1xf32>,
    } else {
    }
    %c1_i32 = arith.constant 1 : i32
    %35 = arith.cmpi eq, %arg1, %c1_i32 : i32
    %36 = arith.extui %35 : i1 to i32
    %c0_i32_15 = arith.constant 0 : i32
    %37 = arith.cmpi ne, %36, %c0_i32_15 : i32
    scf.if %37 {
      %c0_16 = arith.constant 0 : index
      %c0_17 = arith.constant 0 : index
      %38 = vector.load %arg7[%c0_16, %c0_17] : memref<16x1xf32, #tpu.memory_space<vmem>>, vector<16x1xf32>
      %c0_18 = arith.constant 0 : index
      %c0_19 = arith.constant 0 : index
      %39 = vector.load %arg8[%c0_18, %c0_19] : memref<16x1xf32, #tpu.memory_space<vmem>>, vector<16x1xf32>
      %40 = math.log %39 : vector<16x1xf32>
      %41 = arith.addf %38, %40 : vector<16x1xf32>
      %42 = vector.broadcast %41 : vector<16x1xf32> to vector<16x64xf32>
      %43 = arith.subf %26, %42 : vector<16x64xf32>
      %44 = vector.shape_cast %43 : vector<16x64xf32> to vector<2x8x64xf32>
      %c0_20 = arith.constant 0 : index
      %c0_21 = arith.constant 0 : index
      %c0_22 = arith.constant 0 : index
      %45 = vector.load %arg6[%c0_20, %c0_21, %c0_22] : memref<2x8x64xf32, #tpu.memory_space<vmem>>, vector<2x8x64xf32>
      tpu.vector_store %arg6[%c0_20, %c0_21, %c0_22], %44 {strides = array<i32>} : memref<2x8x64xf32, #tpu.memory_space<vmem>>, vector<2x8x64xf32>,
    } else {
    }
    return
  }
  func.func @transform_0(%arg0: i32, %arg1: i32, %arg2: i32) -> (i32, i32, i32) {
    %c0_i32 = arith.constant 0 : i32
    %c0_i32_0 = arith.constant 0 : i32
    %c0_i32_1 = arith.constant 0 : i32
    return %arg0, %c0_i32, %c0_i32_0 : i32, i32, i32
  }
  func.func @transform_1(%arg0: i32, %arg1: i32, %arg2: i32) -> (i32, i32) {
    %c0_i32 = arith.constant 0 : i32
    %c0_i32_0 = arith.constant 0 : i32
    return %c0_i32, %arg2 : i32, i32
  }
  func.func @transform_2(%arg0: i32, %arg1: i32, %arg2: i32) -> (i32, i32) {
    %c0_i32 = arith.constant 0 : i32
    %c0_i32_0 = arith.constant 0 : i32
    return %c0_i32, %arg2 : i32, i32
  }
  func.func @transform_3(%arg0: i32, %arg1: i32, %arg2: i32) -> (i32, i32, i32) {
    %c0_i32 = arith.constant 0 : i32
    %c0_i32_0 = arith.constant 0 : i32
    return %arg0, %c0_i32, %arg2 : i32, i32, i32
  }
}

module attributes {stable_mosaic.version = 11 : i64} {
  func.func @decoder_block_kernel(%arg0: i32, %arg1: memref<2x8x32xbf16, #tpu.memory_space<vmem>>, %arg2: memref<32x96xbf16, #tpu.memory_space<vmem>>, %arg3: memref<1x96xf32, #tpu.memory_space<vmem>>, %arg4: memref<32x32xbf16, #tpu.memory_space<vmem>>, %arg5: memref<1x32xf32, #tpu.memory_space<vmem>>, %arg6: memref<32x64xbf16, #tpu.memory_space<vmem>>, %arg7: memref<1x64xf32, #tpu.memory_space<vmem>>, %arg8: memref<64x32xbf16, #tpu.memory_space<vmem>>, %arg9: memref<1x32xf32, #tpu.memory_space<vmem>>, %arg10: memref<2x8x32xbf16, #tpu.memory_space<vmem>>) attributes {dimension_semantics = [#tpu.dimension_semantics<parallel>], iteration_bounds = array<i64: 1>, scalar_prefetch = 0 : i64, scratch_operands = 0 : i64, tpu.core_type = #tpu.core_type<tc>, window_params = [{transform_indices = @transform_0, window_bounds = array<i64: 2, 8, 32>}, {pipeline_mode = #tpu.pipeline_mode<synchronous>, transform_indices = @transform_1, window_bounds = array<i64: 32, 96>}, {pipeline_mode = #tpu.pipeline_mode<synchronous>, transform_indices = @transform_2, window_bounds = array<i64: 1, 96>}, {pipeline_mode = #tpu.pipeline_mode<synchronous>, transform_indices = @transform_3, window_bounds = array<i64: 32, 32>}, {pipeline_mode = #tpu.pipeline_mode<synchronous>, transform_indices = @transform_4, window_bounds = array<i64: 1, 32>}, {pipeline_mode = #tpu.pipeline_mode<synchronous>, transform_indices = @transform_5, window_bounds = array<i64: 32, 64>}, {pipeline_mode = #tpu.pipeline_mode<synchronous>, transform_indices = @transform_6, window_bounds = array<i64: 1, 64>}, {pipeline_mode = #tpu.pipeline_mode<synchronous>, transform_indices = @transform_7, window_bounds = array<i64: 64, 32>}, {pipeline_mode = #tpu.pipeline_mode<synchronous>, transform_indices = @transform_8, window_bounds = array<i64: 1, 32>}, {transform_indices = @transform_9, window_bounds = array<i64: 2, 8, 32>}]} {
    %c0 = arith.constant 0 : index
    %c0_0 = arith.constant 0 : index
    %c0_1 = arith.constant 0 : index
    %0 = vector.load %arg1[%c0, %c0_0, %c0_1] : memref<2x8x32xbf16, #tpu.memory_space<vmem>>, vector<2x8x32xbf16>
    %1 = arith.extf %0 : vector<2x8x32xbf16> to vector<2x8x32xf32>
    %2 = vector.shape_cast %1 : vector<2x8x32xf32> to vector<16x32xf32>
    %3 = arith.truncf %2 : vector<16x32xf32> to vector<16x32xbf16>
    %c0_2 = arith.constant 0 : index
    %c0_3 = arith.constant 0 : index
    %4 = vector.load %arg2[%c0_2, %c0_3] : memref<32x96xbf16, #tpu.memory_space<vmem>>, vector<32x96xbf16>
    %cst = arith.constant dense<0.000000e+00> : vector<16x96xf32>
    %5 = tpu.matmul %3, %4, %cst {dimension_numbers = #tpu.dot_dimension_numbers<[1], [0], [0], [1], [0, 0, 1, 1], [], []>} : vector<16x32xbf16>, vector<32x96xbf16>, vector<16x96xf32> -> vector<16x96xf32>
    %c0_4 = arith.constant 0 : index
    %c0_5 = arith.constant 0 : index
    %6 = vector.load %arg3[%c0_4, %c0_5] : memref<1x96xf32, #tpu.memory_space<vmem>>, vector<1x96xf32>
    %7 = vector.broadcast %6 : vector<1x96xf32> to vector<16x96xf32>
    %8 = arith.addf %5, %7 : vector<16x96xf32>
    %9 = vector.extract_strided_slice %8 {offsets = [0, 0], sizes = [16, 32], strides = [1, 1]} : vector<16x96xf32> to vector<16x32xf32>
    %10 = vector.extract_strided_slice %8 {offsets = [0, 32], sizes = [16, 32], strides = [1, 1]} : vector<16x96xf32> to vector<16x32xf32>
    %11 = vector.extract_strided_slice %8 {offsets = [0, 64], sizes = [16, 32], strides = [1, 1]} : vector<16x96xf32> to vector<16x32xf32>
    %12 = tpu.iota {dimensions = array<i32: 0>} : vector<8x8xi32>
    %13 = tpu.iota {dimensions = array<i32: 1>} : vector<8x8xi32>
    %14 = arith.cmpi sle, %13, %12 : vector<8x8xi32>
    %15 = vector.extract_strided_slice %9 {offsets = [0, 0], sizes = [16, 8], strides = [1, 1]} : vector<16x32xf32> to vector<16x8xf32>
    %cst_6 = arith.constant dense<0.000000e+00> : vector<16xf32>
    %16 = vector.multi_reduction <add>, %15, %cst_6 [1] : vector<16x8xf32> to vector<16xf32>
    %17 = vector.shape_cast %16 : vector<16xf32> to vector<16x1xf32>
    %cst_7 = arith.constant 8.000000e+00 : f32
    %18 = vector.broadcast %cst_7 : f32 to vector<16x1xf32>
    %19 = arith.divf %17, %18 : vector<16x1xf32>
    %20 = vector.broadcast %19 : vector<16x1xf32> to vector<16x8xf32>
    %21 = arith.subf %15, %20 : vector<16x8xf32>
    %22 = arith.mulf %21, %21 : vector<16x8xf32>
    %cst_8 = arith.constant dense<0.000000e+00> : vector<16xf32>
    %23 = vector.multi_reduction <add>, %22, %cst_8 [1] : vector<16x8xf32> to vector<16xf32>
    %24 = vector.shape_cast %23 : vector<16xf32> to vector<16x1xf32>
    %cst_9 = arith.constant 8.000000e+00 : f32
    %25 = vector.broadcast %cst_9 : f32 to vector<16x1xf32>
    %26 = arith.divf %24, %25 : vector<16x1xf32>
    %27 = vector.broadcast %19 : vector<16x1xf32> to vector<16x8xf32>
    %28 = arith.subf %15, %27 : vector<16x8xf32>
    %cst_10 = arith.constant 9.99999974E-6 : f32
    %29 = vector.broadcast %cst_10 : f32 to vector<16x1xf32>
    %30 = arith.addf %26, %29 : vector<16x1xf32>
    %31 = math.rsqrt %30 : vector<16x1xf32>
    %32 = vector.broadcast %31 : vector<16x1xf32> to vector<16x8xf32>
    %33 = arith.mulf %28, %32 : vector<16x8xf32>
    %cst_11 = arith.constant 0.353553385 : f32
    %34 = vector.broadcast %cst_11 : f32 to vector<16x8xf32>
    %35 = arith.mulf %33, %34 : vector<16x8xf32>
    %36 = vector.shape_cast %35 : vector<16x8xf32> to vector<2x8x8xf32>
    %37 = vector.extract_strided_slice %10 {offsets = [0, 0], sizes = [16, 8], strides = [1, 1]} : vector<16x32xf32> to vector<16x8xf32>
    %cst_12 = arith.constant dense<0.000000e+00> : vector<16xf32>
    %38 = vector.multi_reduction <add>, %37, %cst_12 [1] : vector<16x8xf32> to vector<16xf32>
    %39 = vector.shape_cast %38 : vector<16xf32> to vector<16x1xf32>
    %cst_13 = arith.constant 8.000000e+00 : f32
    %40 = vector.broadcast %cst_13 : f32 to vector<16x1xf32>
    %41 = arith.divf %39, %40 : vector<16x1xf32>
    %42 = vector.broadcast %41 : vector<16x1xf32> to vector<16x8xf32>
    %43 = arith.subf %37, %42 : vector<16x8xf32>
    %44 = arith.mulf %43, %43 : vector<16x8xf32>
    %cst_14 = arith.constant dense<0.000000e+00> : vector<16xf32>
    %45 = vector.multi_reduction <add>, %44, %cst_14 [1] : vector<16x8xf32> to vector<16xf32>
    %46 = vector.shape_cast %45 : vector<16xf32> to vector<16x1xf32>
    %cst_15 = arith.constant 8.000000e+00 : f32
    %47 = vector.broadcast %cst_15 : f32 to vector<16x1xf32>
    %48 = arith.divf %46, %47 : vector<16x1xf32>
    %49 = vector.broadcast %41 : vector<16x1xf32> to vector<16x8xf32>
    %50 = arith.subf %37, %49 : vector<16x8xf32>
    %cst_16 = arith.constant 9.99999974E-6 : f32
    %51 = vector.broadcast %cst_16 : f32 to vector<16x1xf32>
    %52 = arith.addf %48, %51 : vector<16x1xf32>
    %53 = math.rsqrt %52 : vector<16x1xf32>
    %54 = vector.broadcast %53 : vector<16x1xf32> to vector<16x8xf32>
    %55 = arith.mulf %50, %54 : vector<16x8xf32>
    %56 = vector.shape_cast %55 : vector<16x8xf32> to vector<2x8x8xf32>
    %57 = vector.extract_strided_slice %11 {offsets = [0, 0], sizes = [16, 8], strides = [1, 1]} : vector<16x32xf32> to vector<16x8xf32>
    %58 = vector.shape_cast %57 : vector<16x8xf32> to vector<2x8x8xf32>
    %59 = arith.truncf %36 : vector<2x8x8xf32> to vector<2x8x8xbf16>
    %60 = arith.truncf %56 : vector<2x8x8xf32> to vector<2x8x8xbf16>
    "tpu.trace_start"() <{level = 10 : i32, message = "bqd,bkd->bqk"}> : () -> ()
    %cst_17 = arith.constant dense<0.000000e+00> : vector<2x8x8xf32>
    %61 = tpu.matmul %59, %60, %cst_17 {dimension_numbers = #tpu.dot_dimension_numbers<[2], [2], [1], [1], [0, 0, 0, 1, 1, 1], [0], [0]>} : vector<2x8x8xbf16>, vector<2x8x8xbf16>, vector<2x8x8xf32> -> vector<2x8x8xf32>
    %cst_18 = arith.constant -1.000000e+30 : f32
    "tpu.trace_stop"() : () -> ()
    %62 = vector.shape_cast %14 : vector<8x8xi1> to vector<1x8x8xi1>
    %63 = vector.broadcast %62 : vector<1x8x8xi1> to vector<2x8x8xi1>
    %64 = vector.broadcast %cst_18 : f32 to vector<2x8x8xf32>
    %65 = arith.select %63, %61, %64 : vector<2x8x8xi1>, vector<2x8x8xf32>
    %cst_19 = arith.constant dense<0xFF800000> : vector<2x8xf32>
    %66 = vector.multi_reduction <maximumf>, %65, %cst_19 [2] : vector<2x8x8xf32> to vector<2x8xf32>
    %67 = vector.shape_cast %66 : vector<2x8xf32> to vector<2x8x1xf32>
    %68 = vector.broadcast %67 : vector<2x8x1xf32> to vector<2x8x8xf32>
    %69 = arith.subf %65, %68 : vector<2x8x8xf32>
    %70 = math.exp %69 : vector<2x8x8xf32>
    %cst_20 = arith.constant dense<0.000000e+00> : vector<2x8xf32>
    %71 = vector.multi_reduction <add>, %70, %cst_20 [2] : vector<2x8x8xf32> to vector<2x8xf32>
    %72 = vector.shape_cast %71 : vector<2x8xf32> to vector<2x8x1xf32>
    %73 = tpu.reciprocal %72 {approx = true} : vector<2x8x1xf32> -> vector<2x8x1xf32>
    %74 = vector.broadcast %73 : vector<2x8x1xf32> to vector<2x8x8xf32>
    %75 = arith.mulf %70, %74 : vector<2x8x8xf32>
    %76 = arith.truncf %75 : vector<2x8x8xf32> to vector<2x8x8xbf16>
    %77 = arith.truncf %58 : vector<2x8x8xf32> to vector<2x8x8xbf16>
    "tpu.trace_start"() <{level = 10 : i32, message = "bqk,bkd->bqd"}> : () -> ()
    %cst_21 = arith.constant dense<0.000000e+00> : vector<2x8x8xf32>
    %78 = tpu.matmul %76, %77, %cst_21 {dimension_numbers = #tpu.dot_dimension_numbers<[2], [1], [1], [2], [0, 0, 0, 1, 1, 2], [0], [0]>} : vector<2x8x8xbf16>, vector<2x8x8xbf16>, vector<2x8x8xf32> -> vector<2x8x8xf32>
    "tpu.trace_stop"() : () -> ()
    %79 = arith.truncf %78 : vector<2x8x8xf32> to vector<2x8x8xbf16>
    %80 = vector.extract_strided_slice %9 {offsets = [0, 8], sizes = [16, 8], strides = [1, 1]} : vector<16x32xf32> to vector<16x8xf32>
    %cst_22 = arith.constant dense<0.000000e+00> : vector<16xf32>
    %81 = vector.multi_reduction <add>, %80, %cst_22 [1] : vector<16x8xf32> to vector<16xf32>
    %82 = vector.shape_cast %81 : vector<16xf32> to vector<16x1xf32>
    %cst_23 = arith.constant 8.000000e+00 : f32
    %83 = vector.broadcast %cst_23 : f32 to vector<16x1xf32>
    %84 = arith.divf %82, %83 : vector<16x1xf32>
    %85 = vector.broadcast %84 : vector<16x1xf32> to vector<16x8xf32>
    %86 = arith.subf %80, %85 : vector<16x8xf32>
    %87 = arith.mulf %86, %86 : vector<16x8xf32>
    %cst_24 = arith.constant dense<0.000000e+00> : vector<16xf32>
    %88 = vector.multi_reduction <add>, %87, %cst_24 [1] : vector<16x8xf32> to vector<16xf32>
    %89 = vector.shape_cast %88 : vector<16xf32> to vector<16x1xf32>
    %cst_25 = arith.constant 8.000000e+00 : f32
    %90 = vector.broadcast %cst_25 : f32 to vector<16x1xf32>
    %91 = arith.divf %89, %90 : vector<16x1xf32>
    %92 = vector.broadcast %84 : vector<16x1xf32> to vector<16x8xf32>
    %93 = arith.subf %80, %92 : vector<16x8xf32>
    %cst_26 = arith.constant 9.99999974E-6 : f32
    %94 = vector.broadcast %cst_26 : f32 to vector<16x1xf32>
    %95 = arith.addf %91, %94 : vector<16x1xf32>
    %96 = math.rsqrt %95 : vector<16x1xf32>
    %97 = vector.broadcast %96 : vector<16x1xf32> to vector<16x8xf32>
    %98 = arith.mulf %93, %97 : vector<16x8xf32>
    %cst_27 = arith.constant 0.353553385 : f32
    %99 = vector.broadcast %cst_27 : f32 to vector<16x8xf32>
    %100 = arith.mulf %98, %99 : vector<16x8xf32>
    %101 = vector.shape_cast %100 : vector<16x8xf32> to vector<2x8x8xf32>
    %102 = vector.extract_strided_slice %10 {offsets = [0, 8], sizes = [16, 8], strides = [1, 1]} : vector<16x32xf32> to vector<16x8xf32>
    %cst_28 = arith.constant dense<0.000000e+00> : vector<16xf32>
    %103 = vector.multi_reduction <add>, %102, %cst_28 [1] : vector<16x8xf32> to vector<16xf32>
    %104 = vector.shape_cast %103 : vector<16xf32> to vector<16x1xf32>
    %cst_29 = arith.constant 8.000000e+00 : f32
    %105 = vector.broadcast %cst_29 : f32 to vector<16x1xf32>
    %106 = arith.divf %104, %105 : vector<16x1xf32>
    %107 = vector.broadcast %106 : vector<16x1xf32> to vector<16x8xf32>
    %108 = arith.subf %102, %107 : vector<16x8xf32>
    %109 = arith.mulf %108, %108 : vector<16x8xf32>
    %cst_30 = arith.constant dense<0.000000e+00> : vector<16xf32>
    %110 = vector.multi_reduction <add>, %109, %cst_30 [1] : vector<16x8xf32> to vector<16xf32>
    %111 = vector.shape_cast %110 : vector<16xf32> to vector<16x1xf32>
    %cst_31 = arith.constant 8.000000e+00 : f32
    %112 = vector.broadcast %cst_31 : f32 to vector<16x1xf32>
    %113 = arith.divf %111, %112 : vector<16x1xf32>
    %114 = vector.broadcast %106 : vector<16x1xf32> to vector<16x8xf32>
    %115 = arith.subf %102, %114 : vector<16x8xf32>
    %cst_32 = arith.constant 9.99999974E-6 : f32
    %116 = vector.broadcast %cst_32 : f32 to vector<16x1xf32>
    %117 = arith.addf %113, %116 : vector<16x1xf32>
    %118 = math.rsqrt %117 : vector<16x1xf32>
    %119 = vector.broadcast %118 : vector<16x1xf32> to vector<16x8xf32>
    %120 = arith.mulf %115, %119 : vector<16x8xf32>
    %121 = vector.shape_cast %120 : vector<16x8xf32> to vector<2x8x8xf32>
    %122 = vector.extract_strided_slice %11 {offsets = [0, 8], sizes = [16, 8], strides = [1, 1]} : vector<16x32xf32> to vector<16x8xf32>
    %123 = vector.shape_cast %122 : vector<16x8xf32> to vector<2x8x8xf32>
    %124 = arith.truncf %101 : vector<2x8x8xf32> to vector<2x8x8xbf16>
    %125 = arith.truncf %121 : vector<2x8x8xf32> to vector<2x8x8xbf16>
    "tpu.trace_start"() <{level = 10 : i32, message = "bqd,bkd->bqk"}> : () -> ()
    %cst_33 = arith.constant dense<0.000000e+00> : vector<2x8x8xf32>
    %126 = tpu.matmul %124, %125, %cst_33 {dimension_numbers = #tpu.dot_dimension_numbers<[2], [2], [1], [1], [0, 0, 0, 1, 1, 1], [0], [0]>} : vector<2x8x8xbf16>, vector<2x8x8xbf16>, vector<2x8x8xf32> -> vector<2x8x8xf32>
    %cst_34 = arith.constant -1.000000e+30 : f32
    "tpu.trace_stop"() : () -> ()
    %127 = vector.shape_cast %14 : vector<8x8xi1> to vector<1x8x8xi1>
    %128 = vector.broadcast %127 : vector<1x8x8xi1> to vector<2x8x8xi1>
    %129 = vector.broadcast %cst_34 : f32 to vector<2x8x8xf32>
    %130 = arith.select %128, %126, %129 : vector<2x8x8xi1>, vector<2x8x8xf32>
    %cst_35 = arith.constant dense<0xFF800000> : vector<2x8xf32>
    %131 = vector.multi_reduction <maximumf>, %130, %cst_35 [2] : vector<2x8x8xf32> to vector<2x8xf32>
    %132 = vector.shape_cast %131 : vector<2x8xf32> to vector<2x8x1xf32>
    %133 = vector.broadcast %132 : vector<2x8x1xf32> to vector<2x8x8xf32>
    %134 = arith.subf %130, %133 : vector<2x8x8xf32>
    %135 = math.exp %134 : vector<2x8x8xf32>
    %cst_36 = arith.constant dense<0.000000e+00> : vector<2x8xf32>
    %136 = vector.multi_reduction <add>, %135, %cst_36 [2] : vector<2x8x8xf32> to vector<2x8xf32>
    %137 = vector.shape_cast %136 : vector<2x8xf32> to vector<2x8x1xf32>
    %138 = tpu.reciprocal %137 {approx = true} : vector<2x8x1xf32> -> vector<2x8x1xf32>
    %139 = vector.broadcast %138 : vector<2x8x1xf32> to vector<2x8x8xf32>
    %140 = arith.mulf %135, %139 : vector<2x8x8xf32>
    %141 = arith.truncf %140 : vector<2x8x8xf32> to vector<2x8x8xbf16>
    %142 = arith.truncf %123 : vector<2x8x8xf32> to vector<2x8x8xbf16>
    "tpu.trace_start"() <{level = 10 : i32, message = "bqk,bkd->bqd"}> : () -> ()
    %cst_37 = arith.constant dense<0.000000e+00> : vector<2x8x8xf32>
    %143 = tpu.matmul %141, %142, %cst_37 {dimension_numbers = #tpu.dot_dimension_numbers<[2], [1], [1], [2], [0, 0, 0, 1, 1, 2], [0], [0]>} : vector<2x8x8xbf16>, vector<2x8x8xbf16>, vector<2x8x8xf32> -> vector<2x8x8xf32>
    "tpu.trace_stop"() : () -> ()
    %144 = arith.truncf %143 : vector<2x8x8xf32> to vector<2x8x8xbf16>
    %145 = vector.extract_strided_slice %9 {offsets = [0, 16], sizes = [16, 8], strides = [1, 1]} : vector<16x32xf32> to vector<16x8xf32>
    %cst_38 = arith.constant dense<0.000000e+00> : vector<16xf32>
    %146 = vector.multi_reduction <add>, %145, %cst_38 [1] : vector<16x8xf32> to vector<16xf32>
    %147 = vector.shape_cast %146 : vector<16xf32> to vector<16x1xf32>
    %cst_39 = arith.constant 8.000000e+00 : f32
    %148 = vector.broadcast %cst_39 : f32 to vector<16x1xf32>
    %149 = arith.divf %147, %148 : vector<16x1xf32>
    %150 = vector.broadcast %149 : vector<16x1xf32> to vector<16x8xf32>
    %151 = arith.subf %145, %150 : vector<16x8xf32>
    %152 = arith.mulf %151, %151 : vector<16x8xf32>
    %cst_40 = arith.constant dense<0.000000e+00> : vector<16xf32>
    %153 = vector.multi_reduction <add>, %152, %cst_40 [1] : vector<16x8xf32> to vector<16xf32>
    %154 = vector.shape_cast %153 : vector<16xf32> to vector<16x1xf32>
    %cst_41 = arith.constant 8.000000e+00 : f32
    %155 = vector.broadcast %cst_41 : f32 to vector<16x1xf32>
    %156 = arith.divf %154, %155 : vector<16x1xf32>
    %157 = vector.broadcast %149 : vector<16x1xf32> to vector<16x8xf32>
    %158 = arith.subf %145, %157 : vector<16x8xf32>
    %cst_42 = arith.constant 9.99999974E-6 : f32
    %159 = vector.broadcast %cst_42 : f32 to vector<16x1xf32>
    %160 = arith.addf %156, %159 : vector<16x1xf32>
    %161 = math.rsqrt %160 : vector<16x1xf32>
    %162 = vector.broadcast %161 : vector<16x1xf32> to vector<16x8xf32>
    %163 = arith.mulf %158, %162 : vector<16x8xf32>
    %cst_43 = arith.constant 0.353553385 : f32
    %164 = vector.broadcast %cst_43 : f32 to vector<16x8xf32>
    %165 = arith.mulf %163, %164 : vector<16x8xf32>
    %166 = vector.shape_cast %165 : vector<16x8xf32> to vector<2x8x8xf32>
    %167 = vector.extract_strided_slice %10 {offsets = [0, 16], sizes = [16, 8], strides = [1, 1]} : vector<16x32xf32> to vector<16x8xf32>
    %cst_44 = arith.constant dense<0.000000e+00> : vector<16xf32>
    %168 = vector.multi_reduction <add>, %167, %cst_44 [1] : vector<16x8xf32> to vector<16xf32>
    %169 = vector.shape_cast %168 : vector<16xf32> to vector<16x1xf32>
    %cst_45 = arith.constant 8.000000e+00 : f32
    %170 = vector.broadcast %cst_45 : f32 to vector<16x1xf32>
    %171 = arith.divf %169, %170 : vector<16x1xf32>
    %172 = vector.broadcast %171 : vector<16x1xf32> to vector<16x8xf32>
    %173 = arith.subf %167, %172 : vector<16x8xf32>
    %174 = arith.mulf %173, %173 : vector<16x8xf32>
    %cst_46 = arith.constant dense<0.000000e+00> : vector<16xf32>
    %175 = vector.multi_reduction <add>, %174, %cst_46 [1] : vector<16x8xf32> to vector<16xf32>
    %176 = vector.shape_cast %175 : vector<16xf32> to vector<16x1xf32>
    %cst_47 = arith.constant 8.000000e+00 : f32
    %177 = vector.broadcast %cst_47 : f32 to vector<16x1xf32>
    %178 = arith.divf %176, %177 : vector<16x1xf32>
    %179 = vector.broadcast %171 : vector<16x1xf32> to vector<16x8xf32>
    %180 = arith.subf %167, %179 : vector<16x8xf32>
    %cst_48 = arith.constant 9.99999974E-6 : f32
    %181 = vector.broadcast %cst_48 : f32 to vector<16x1xf32>
    %182 = arith.addf %178, %181 : vector<16x1xf32>
    %183 = math.rsqrt %182 : vector<16x1xf32>
    %184 = vector.broadcast %183 : vector<16x1xf32> to vector<16x8xf32>
    %185 = arith.mulf %180, %184 : vector<16x8xf32>
    %186 = vector.shape_cast %185 : vector<16x8xf32> to vector<2x8x8xf32>
    %187 = vector.extract_strided_slice %11 {offsets = [0, 16], sizes = [16, 8], strides = [1, 1]} : vector<16x32xf32> to vector<16x8xf32>
    %188 = vector.shape_cast %187 : vector<16x8xf32> to vector<2x8x8xf32>
    %189 = arith.truncf %166 : vector<2x8x8xf32> to vector<2x8x8xbf16>
    %190 = arith.truncf %186 : vector<2x8x8xf32> to vector<2x8x8xbf16>
    "tpu.trace_start"() <{level = 10 : i32, message = "bqd,bkd->bqk"}> : () -> ()
    %cst_49 = arith.constant dense<0.000000e+00> : vector<2x8x8xf32>
    %191 = tpu.matmul %189, %190, %cst_49 {dimension_numbers = #tpu.dot_dimension_numbers<[2], [2], [1], [1], [0, 0, 0, 1, 1, 1], [0], [0]>} : vector<2x8x8xbf16>, vector<2x8x8xbf16>, vector<2x8x8xf32> -> vector<2x8x8xf32>
    %cst_50 = arith.constant -1.000000e+30 : f32
    "tpu.trace_stop"() : () -> ()
    %192 = vector.shape_cast %14 : vector<8x8xi1> to vector<1x8x8xi1>
    %193 = vector.broadcast %192 : vector<1x8x8xi1> to vector<2x8x8xi1>
    %194 = vector.broadcast %cst_50 : f32 to vector<2x8x8xf32>
    %195 = arith.select %193, %191, %194 : vector<2x8x8xi1>, vector<2x8x8xf32>
    %cst_51 = arith.constant dense<0xFF800000> : vector<2x8xf32>
    %196 = vector.multi_reduction <maximumf>, %195, %cst_51 [2] : vector<2x8x8xf32> to vector<2x8xf32>
    %197 = vector.shape_cast %196 : vector<2x8xf32> to vector<2x8x1xf32>
    %198 = vector.broadcast %197 : vector<2x8x1xf32> to vector<2x8x8xf32>
    %199 = arith.subf %195, %198 : vector<2x8x8xf32>
    %200 = math.exp %199 : vector<2x8x8xf32>
    %cst_52 = arith.constant dense<0.000000e+00> : vector<2x8xf32>
    %201 = vector.multi_reduction <add>, %200, %cst_52 [2] : vector<2x8x8xf32> to vector<2x8xf32>
    %202 = vector.shape_cast %201 : vector<2x8xf32> to vector<2x8x1xf32>
    %203 = tpu.reciprocal %202 {approx = true} : vector<2x8x1xf32> -> vector<2x8x1xf32>
    %204 = vector.broadcast %203 : vector<2x8x1xf32> to vector<2x8x8xf32>
    %205 = arith.mulf %200, %204 : vector<2x8x8xf32>
    %206 = arith.truncf %205 : vector<2x8x8xf32> to vector<2x8x8xbf16>
    %207 = arith.truncf %188 : vector<2x8x8xf32> to vector<2x8x8xbf16>
    "tpu.trace_start"() <{level = 10 : i32, message = "bqk,bkd->bqd"}> : () -> ()
    %cst_53 = arith.constant dense<0.000000e+00> : vector<2x8x8xf32>
    %208 = tpu.matmul %206, %207, %cst_53 {dimension_numbers = #tpu.dot_dimension_numbers<[2], [1], [1], [2], [0, 0, 0, 1, 1, 2], [0], [0]>} : vector<2x8x8xbf16>, vector<2x8x8xbf16>, vector<2x8x8xf32> -> vector<2x8x8xf32>
    "tpu.trace_stop"() : () -> ()
    %209 = arith.truncf %208 : vector<2x8x8xf32> to vector<2x8x8xbf16>
    %210 = vector.extract_strided_slice %9 {offsets = [0, 24], sizes = [16, 8], strides = [1, 1]} : vector<16x32xf32> to vector<16x8xf32>
    %cst_54 = arith.constant dense<0.000000e+00> : vector<16xf32>
    %211 = vector.multi_reduction <add>, %210, %cst_54 [1] : vector<16x8xf32> to vector<16xf32>
    %212 = vector.shape_cast %211 : vector<16xf32> to vector<16x1xf32>
    %cst_55 = arith.constant 8.000000e+00 : f32
    %213 = vector.broadcast %cst_55 : f32 to vector<16x1xf32>
    %214 = arith.divf %212, %213 : vector<16x1xf32>
    %215 = vector.broadcast %214 : vector<16x1xf32> to vector<16x8xf32>
    %216 = arith.subf %210, %215 : vector<16x8xf32>
    %217 = arith.mulf %216, %216 : vector<16x8xf32>
    %cst_56 = arith.constant dense<0.000000e+00> : vector<16xf32>
    %218 = vector.multi_reduction <add>, %217, %cst_56 [1] : vector<16x8xf32> to vector<16xf32>
    %219 = vector.shape_cast %218 : vector<16xf32> to vector<16x1xf32>
    %cst_57 = arith.constant 8.000000e+00 : f32
    %220 = vector.broadcast %cst_57 : f32 to vector<16x1xf32>
    %221 = arith.divf %219, %220 : vector<16x1xf32>
    %222 = vector.broadcast %214 : vector<16x1xf32> to vector<16x8xf32>
    %223 = arith.subf %210, %222 : vector<16x8xf32>
    %cst_58 = arith.constant 9.99999974E-6 : f32
    %224 = vector.broadcast %cst_58 : f32 to vector<16x1xf32>
    %225 = arith.addf %221, %224 : vector<16x1xf32>
    %226 = math.rsqrt %225 : vector<16x1xf32>
    %227 = vector.broadcast %226 : vector<16x1xf32> to vector<16x8xf32>
    %228 = arith.mulf %223, %227 : vector<16x8xf32>
    %cst_59 = arith.constant 0.353553385 : f32
    %229 = vector.broadcast %cst_59 : f32 to vector<16x8xf32>
    %230 = arith.mulf %228, %229 : vector<16x8xf32>
    %231 = vector.shape_cast %230 : vector<16x8xf32> to vector<2x8x8xf32>
    %232 = vector.extract_strided_slice %10 {offsets = [0, 24], sizes = [16, 8], strides = [1, 1]} : vector<16x32xf32> to vector<16x8xf32>
    %cst_60 = arith.constant dense<0.000000e+00> : vector<16xf32>
    %233 = vector.multi_reduction <add>, %232, %cst_60 [1] : vector<16x8xf32> to vector<16xf32>
    %234 = vector.shape_cast %233 : vector<16xf32> to vector<16x1xf32>
    %cst_61 = arith.constant 8.000000e+00 : f32
    %235 = vector.broadcast %cst_61 : f32 to vector<16x1xf32>
    %236 = arith.divf %234, %235 : vector<16x1xf32>
    %237 = vector.broadcast %236 : vector<16x1xf32> to vector<16x8xf32>
    %238 = arith.subf %232, %237 : vector<16x8xf32>
    %239 = arith.mulf %238, %238 : vector<16x8xf32>
    %cst_62 = arith.constant dense<0.000000e+00> : vector<16xf32>
    %240 = vector.multi_reduction <add>, %239, %cst_62 [1] : vector<16x8xf32> to vector<16xf32>
    %241 = vector.shape_cast %240 : vector<16xf32> to vector<16x1xf32>
    %cst_63 = arith.constant 8.000000e+00 : f32
    %242 = vector.broadcast %cst_63 : f32 to vector<16x1xf32>
    %243 = arith.divf %241, %242 : vector<16x1xf32>
    %244 = vector.broadcast %236 : vector<16x1xf32> to vector<16x8xf32>
    %245 = arith.subf %232, %244 : vector<16x8xf32>
    %cst_64 = arith.constant 9.99999974E-6 : f32
    %246 = vector.broadcast %cst_64 : f32 to vector<16x1xf32>
    %247 = arith.addf %243, %246 : vector<16x1xf32>
    %248 = math.rsqrt %247 : vector<16x1xf32>
    %249 = vector.broadcast %248 : vector<16x1xf32> to vector<16x8xf32>
    %250 = arith.mulf %245, %249 : vector<16x8xf32>
    %251 = vector.shape_cast %250 : vector<16x8xf32> to vector<2x8x8xf32>
    %252 = vector.extract_strided_slice %11 {offsets = [0, 24], sizes = [16, 8], strides = [1, 1]} : vector<16x32xf32> to vector<16x8xf32>
    %253 = vector.shape_cast %252 : vector<16x8xf32> to vector<2x8x8xf32>
    %254 = arith.truncf %231 : vector<2x8x8xf32> to vector<2x8x8xbf16>
    %255 = arith.truncf %251 : vector<2x8x8xf32> to vector<2x8x8xbf16>
    "tpu.trace_start"() <{level = 10 : i32, message = "bqd,bkd->bqk"}> : () -> ()
    %cst_65 = arith.constant dense<0.000000e+00> : vector<2x8x8xf32>
    %256 = tpu.matmul %254, %255, %cst_65 {dimension_numbers = #tpu.dot_dimension_numbers<[2], [2], [1], [1], [0, 0, 0, 1, 1, 1], [0], [0]>} : vector<2x8x8xbf16>, vector<2x8x8xbf16>, vector<2x8x8xf32> -> vector<2x8x8xf32>
    %cst_66 = arith.constant -1.000000e+30 : f32
    "tpu.trace_stop"() : () -> ()
    %257 = vector.shape_cast %14 : vector<8x8xi1> to vector<1x8x8xi1>
    %258 = vector.broadcast %257 : vector<1x8x8xi1> to vector<2x8x8xi1>
    %259 = vector.broadcast %cst_66 : f32 to vector<2x8x8xf32>
    %260 = arith.select %258, %256, %259 : vector<2x8x8xi1>, vector<2x8x8xf32>
    %cst_67 = arith.constant dense<0xFF800000> : vector<2x8xf32>
    %261 = vector.multi_reduction <maximumf>, %260, %cst_67 [2] : vector<2x8x8xf32> to vector<2x8xf32>
    %262 = vector.shape_cast %261 : vector<2x8xf32> to vector<2x8x1xf32>
    %263 = vector.broadcast %262 : vector<2x8x1xf32> to vector<2x8x8xf32>
    %264 = arith.subf %260, %263 : vector<2x8x8xf32>
    %265 = math.exp %264 : vector<2x8x8xf32>
    %cst_68 = arith.constant dense<0.000000e+00> : vector<2x8xf32>
    %266 = vector.multi_reduction <add>, %265, %cst_68 [2] : vector<2x8x8xf32> to vector<2x8xf32>
    %267 = vector.shape_cast %266 : vector<2x8xf32> to vector<2x8x1xf32>
    %268 = tpu.reciprocal %267 {approx = true} : vector<2x8x1xf32> -> vector<2x8x1xf32>
    %269 = vector.broadcast %268 : vector<2x8x1xf32> to vector<2x8x8xf32>
    %270 = arith.mulf %265, %269 : vector<2x8x8xf32>
    %271 = arith.truncf %270 : vector<2x8x8xf32> to vector<2x8x8xbf16>
    %272 = arith.truncf %253 : vector<2x8x8xf32> to vector<2x8x8xbf16>
    "tpu.trace_start"() <{level = 10 : i32, message = "bqk,bkd->bqd"}> : () -> ()
    %cst_69 = arith.constant dense<0.000000e+00> : vector<2x8x8xf32>
    %273 = tpu.matmul %271, %272, %cst_69 {dimension_numbers = #tpu.dot_dimension_numbers<[2], [1], [1], [2], [0, 0, 0, 1, 1, 2], [0], [0]>} : vector<2x8x8xbf16>, vector<2x8x8xbf16>, vector<2x8x8xf32> -> vector<2x8x8xf32>
    "tpu.trace_stop"() : () -> ()
    %274 = arith.truncf %273 : vector<2x8x8xf32> to vector<2x8x8xbf16>
    %275 = tpu.concatenate %79, %144, %209, %274 in 2 : vector<2x8x8xbf16>, vector<2x8x8xbf16>, vector<2x8x8xbf16>, vector<2x8x8xbf16> -> vector<2x8x32xbf16>
    %276 = vector.shape_cast %275 : vector<2x8x32xbf16> to vector<16x32xbf16>
    %c0_70 = arith.constant 0 : index
    %c0_71 = arith.constant 0 : index
    %277 = vector.load %arg4[%c0_70, %c0_71] : memref<32x32xbf16, #tpu.memory_space<vmem>>, vector<32x32xbf16>
    %cst_72 = arith.constant dense<0.000000e+00> : vector<16x32xf32>
    %278 = tpu.matmul %276, %277, %cst_72 {dimension_numbers = #tpu.dot_dimension_numbers<[1], [0], [0], [1], [0, 0, 1, 1], [], []>} : vector<16x32xbf16>, vector<32x32xbf16>, vector<16x32xf32> -> vector<16x32xf32>
    %c0_73 = arith.constant 0 : index
    %c0_74 = arith.constant 0 : index
    %279 = vector.load %arg5[%c0_73, %c0_74] : memref<1x32xf32, #tpu.memory_space<vmem>>, vector<1x32xf32>
    %280 = vector.broadcast %279 : vector<1x32xf32> to vector<16x32xf32>
    %281 = arith.addf %278, %280 : vector<16x32xf32>
    %cst_75 = arith.constant 1.000000e+00 : f32
    %282 = vector.broadcast %cst_75 : f32 to vector<16x32xf32>
    %283 = arith.mulf %282, %281 : vector<16x32xf32>
    %284 = arith.addf %2, %283 : vector<16x32xf32>
    %cst_76 = arith.constant dense<0.000000e+00> : vector<16xf32>
    %285 = vector.multi_reduction <add>, %284, %cst_76 [1] : vector<16x32xf32> to vector<16xf32>
    %286 = vector.shape_cast %285 : vector<16xf32> to vector<16x1xf32>
    %cst_77 = arith.constant 3.200000e+01 : f32
    %287 = vector.broadcast %cst_77 : f32 to vector<16x1xf32>
    %288 = arith.divf %286, %287 : vector<16x1xf32>
    %289 = vector.broadcast %288 : vector<16x1xf32> to vector<16x32xf32>
    %290 = arith.subf %284, %289 : vector<16x32xf32>
    %291 = arith.mulf %290, %290 : vector<16x32xf32>
    %cst_78 = arith.constant dense<0.000000e+00> : vector<16xf32>
    %292 = vector.multi_reduction <add>, %291, %cst_78 [1] : vector<16x32xf32> to vector<16xf32>
    %293 = vector.shape_cast %292 : vector<16xf32> to vector<16x1xf32>
    %cst_79 = arith.constant 3.200000e+01 : f32
    %294 = vector.broadcast %cst_79 : f32 to vector<16x1xf32>
    %295 = arith.divf %293, %294 : vector<16x1xf32>
    %296 = vector.broadcast %288 : vector<16x1xf32> to vector<16x32xf32>
    %297 = arith.subf %284, %296 : vector<16x32xf32>
    %cst_80 = arith.constant 9.99999974E-6 : f32
    %298 = vector.broadcast %cst_80 : f32 to vector<16x1xf32>
    %299 = arith.addf %295, %298 : vector<16x1xf32>
    %300 = math.rsqrt %299 : vector<16x1xf32>
    %301 = vector.broadcast %300 : vector<16x1xf32> to vector<16x32xf32>
    %302 = arith.mulf %297, %301 : vector<16x32xf32>
    %303 = arith.truncf %302 : vector<16x32xf32> to vector<16x32xbf16>
    %c0_81 = arith.constant 0 : index
    %c0_82 = arith.constant 0 : index
    %304 = vector.load %arg6[%c0_81, %c0_82] : memref<32x64xbf16, #tpu.memory_space<vmem>>, vector<32x64xbf16>
    %cst_83 = arith.constant dense<0.000000e+00> : vector<16x64xf32>
    %305 = tpu.matmul %303, %304, %cst_83 {dimension_numbers = #tpu.dot_dimension_numbers<[1], [0], [0], [1], [0, 0, 1, 1], [], []>} : vector<16x32xbf16>, vector<32x64xbf16>, vector<16x64xf32> -> vector<16x64xf32>
    %c0_84 = arith.constant 0 : index
    %c0_85 = arith.constant 0 : index
    %306 = vector.load %arg7[%c0_84, %c0_85] : memref<1x64xf32, #tpu.memory_space<vmem>>, vector<1x64xf32>
    %307 = vector.broadcast %306 : vector<1x64xf32> to vector<16x64xf32>
    %308 = arith.addf %305, %307 : vector<16x64xf32>
    %cst_86 = arith.constant 0.000000e+00 : f32
    %309 = vector.broadcast %cst_86 : f32 to vector<16x64xf32>
    %310 = arith.maximumf %308, %309 : vector<16x64xf32>
    %311 = arith.truncf %310 : vector<16x64xf32> to vector<16x64xbf16>
    %c0_87 = arith.constant 0 : index
    %c0_88 = arith.constant 0 : index
    %312 = vector.load %arg8[%c0_87, %c0_88] : memref<64x32xbf16, #tpu.memory_space<vmem>>, vector<64x32xbf16>
    %cst_89 = arith.constant dense<0.000000e+00> : vector<16x32xf32>
    %313 = tpu.matmul %311, %312, %cst_89 {dimension_numbers = #tpu.dot_dimension_numbers<[1], [0], [0], [1], [0, 0, 1, 1], [], []>} : vector<16x64xbf16>, vector<64x32xbf16>, vector<16x32xf32> -> vector<16x32xf32>
    %c0_90 = arith.constant 0 : index
    %c0_91 = arith.constant 0 : index
    %314 = vector.load %arg9[%c0_90, %c0_91] : memref<1x32xf32, #tpu.memory_space<vmem>>, vector<1x32xf32>
    %315 = vector.broadcast %314 : vector<1x32xf32> to vector<16x32xf32>
    %316 = arith.addf %313, %315 : vector<16x32xf32>
    %cst_92 = arith.constant 1.000000e+00 : f32
    %317 = vector.broadcast %cst_92 : f32 to vector<16x32xf32>
    %318 = arith.mulf %317, %316 : vector<16x32xf32>
    %319 = arith.addf %302, %318 : vector<16x32xf32>
    %cst_93 = arith.constant dense<0.000000e+00> : vector<16xf32>
    %320 = vector.multi_reduction <add>, %319, %cst_93 [1] : vector<16x32xf32> to vector<16xf32>
    %321 = vector.shape_cast %320 : vector<16xf32> to vector<16x1xf32>
    %cst_94 = arith.constant 3.200000e+01 : f32
    %322 = vector.broadcast %cst_94 : f32 to vector<16x1xf32>
    %323 = arith.divf %321, %322 : vector<16x1xf32>
    %324 = vector.broadcast %323 : vector<16x1xf32> to vector<16x32xf32>
    %325 = arith.subf %319, %324 : vector<16x32xf32>
    %326 = arith.mulf %325, %325 : vector<16x32xf32>
    %cst_95 = arith.constant dense<0.000000e+00> : vector<16xf32>
    %327 = vector.multi_reduction <add>, %326, %cst_95 [1] : vector<16x32xf32> to vector<16xf32>
    %328 = vector.shape_cast %327 : vector<16xf32> to vector<16x1xf32>
    %cst_96 = arith.constant 3.200000e+01 : f32
    %329 = vector.broadcast %cst_96 : f32 to vector<16x1xf32>
    %330 = arith.divf %328, %329 : vector<16x1xf32>
    %331 = vector.broadcast %323 : vector<16x1xf32> to vector<16x32xf32>
    %332 = arith.subf %319, %331 : vector<16x32xf32>
    %cst_97 = arith.constant 9.99999974E-6 : f32
    %333 = vector.broadcast %cst_97 : f32 to vector<16x1xf32>
    %334 = arith.addf %330, %333 : vector<16x1xf32>
    %335 = math.rsqrt %334 : vector<16x1xf32>
    %336 = vector.broadcast %335 : vector<16x1xf32> to vector<16x32xf32>
    %337 = arith.mulf %332, %336 : vector<16x32xf32>
    %338 = vector.shape_cast %337 : vector<16x32xf32> to vector<2x8x32xf32>
    %339 = arith.truncf %338 : vector<2x8x32xf32> to vector<2x8x32xbf16>
    %c0_98 = arith.constant 0 : index
    %c0_99 = arith.constant 0 : index
    %c0_100 = arith.constant 0 : index
    %340 = vector.load %arg10[%c0_98, %c0_99, %c0_100] : memref<2x8x32xbf16, #tpu.memory_space<vmem>>, vector<2x8x32xbf16>
    tpu.vector_store %arg10[%c0_98, %c0_99, %c0_100], %339 {strides = array<i32>} : memref<2x8x32xbf16, #tpu.memory_space<vmem>>, vector<2x8x32xbf16>,
    return
  }
  func.func @transform_0(%arg0: i32) -> (i32, i32, i32) {
    %c0_i32 = arith.constant 0 : i32
    %c0_i32_0 = arith.constant 0 : i32
    %c0_i32_1 = arith.constant 0 : i32
    return %arg0, %c0_i32, %c0_i32_0 : i32, i32, i32
  }
  func.func @transform_1(%arg0: i32) -> (i32, i32) {
    %c0_i32 = arith.constant 0 : i32
    %c0_i32_0 = arith.constant 0 : i32
    %c0_i32_1 = arith.constant 0 : i32
    return %c0_i32, %c0_i32_0 : i32, i32
  }
  func.func @transform_2(%arg0: i32) -> (i32, i32) {
    %c0_i32 = arith.constant 0 : i32
    %c0_i32_0 = arith.constant 0 : i32
    %c0_i32_1 = arith.constant 0 : i32
    return %c0_i32, %c0_i32_0 : i32, i32
  }
  func.func @transform_3(%arg0: i32) -> (i32, i32) {
    %c0_i32 = arith.constant 0 : i32
    %c0_i32_0 = arith.constant 0 : i32
    %c0_i32_1 = arith.constant 0 : i32
    return %c0_i32, %c0_i32_0 : i32, i32
  }
  func.func @transform_4(%arg0: i32) -> (i32, i32) {
    %c0_i32 = arith.constant 0 : i32
    %c0_i32_0 = arith.constant 0 : i32
    %c0_i32_1 = arith.constant 0 : i32
    return %c0_i32, %c0_i32_0 : i32, i32
  }
  func.func @transform_5(%arg0: i32) -> (i32, i32) {
    %c0_i32 = arith.constant 0 : i32
    %c0_i32_0 = arith.constant 0 : i32
    %c0_i32_1 = arith.constant 0 : i32
    return %c0_i32, %c0_i32_0 : i32, i32
  }
  func.func @transform_6(%arg0: i32) -> (i32, i32) {
    %c0_i32 = arith.constant 0 : i32
    %c0_i32_0 = arith.constant 0 : i32
    %c0_i32_1 = arith.constant 0 : i32
    return %c0_i32, %c0_i32_0 : i32, i32
  }
  func.func @transform_7(%arg0: i32) -> (i32, i32) {
    %c0_i32 = arith.constant 0 : i32
    %c0_i32_0 = arith.constant 0 : i32
    %c0_i32_1 = arith.constant 0 : i32
    return %c0_i32, %c0_i32_0 : i32, i32
  }
  func.func @transform_8(%arg0: i32) -> (i32, i32) {
    %c0_i32 = arith.constant 0 : i32
    %c0_i32_0 = arith.constant 0 : i32
    %c0_i32_1 = arith.constant 0 : i32
    return %c0_i32, %c0_i32_0 : i32, i32
  }
  func.func @transform_9(%arg0: i32) -> (i32, i32, i32) {
    %c0_i32 = arith.constant 0 : i32
    %c0_i32_0 = arith.constant 0 : i32
    %c0_i32_1 = arith.constant 0 : i32
    return %arg0, %c0_i32, %c0_i32_0 : i32, i32, i32
  }
}

</mosaic_0001>

<bundles_post_ra>
// kernel: transformer_forward.5
= control target key start
LH: loop header
LB: loop body
LE: loop exit
PB: predicated region body
PF: predicated region fallthrough
CT: control target
= control target key end

     0   :  { %8 = vsyncpa [#allocation5], 0  ;;  %s1010_s0 = inlined_call_operand.hbm [shape: bf16[2,8,32], index: 0, kind: input, shape index: {}]   ;;  %s1011_s1 = inlined_call_operand.hbm [shape: bf16[32,64], index: 1, kind: input, shape index: {}]   ;;  %s1012_s2 = inlined_call_operand.hbm [shape: f32[1,64], index: 2, kind: input, shape index: {}]   ;;  %s1013_s3 = inlined_call_operand.hbm [shape: f32[2,8,64], index: 3, kind: output, shape index: {}]  }
   0x1   :  { %9 = vsyncpa [#allocation8], 0 }
   0x2   :  { %10 = vsyncpa [#allocation6], 0  ;;  %s825_s12 = smov 0   ;;  %s827_s13 = smov 0  }
   0x3   :  { %s829_s14 = smov 0  }
   0x4 LB: > { %s516_s15 = sadd.s32 4294967295, %s789_s14   ;;  %p517_p0 = scmp.ge.s32.totalorder %s789_s14, 1  ;;  %s789_s14 = sphi %s829_s14, %s16_s14   ;;  %s785_s13 = sphi %s827_s13, %s1026_s13   ;;  %s781_s12 = sphi %s825_s12, %s1025_s12  }
   0x5   : > { %p146_p1 = scmp.lt.s32.totalorder %s789_s14, 3  ;;  %p845_p2 = scmp.eq.s32.totalorder %s516_s15, 0 }
   0x6   : > { %s791_s18 = smov [#allocation7]   ;;  %s31_s21 = sadd.s32 1, %s785_s13 }
   0x7   : > { %s1017_s16 = scalar_select %p845_p2, 1, 0 }
   0x8   : > { %p849_p3 = pnand %p517_p0, %p146_p1  ;;  %s176_s19 = sshll.u32 %s791_s18, 4  ;;  %s853_s19 = int_to_ptr.vmem [resolvable:$true] %s176_s19 }
   0x9   : > { %p864_p6 = scmp.ge.s32.totalorder %s31_s21, 2  ;;  %s792_s23 = smov [#allocation4]  }
   0xa   : > { %s1018_s17 = scalar_select %p849_p3, 1, 0 }
   0xb   : > { %p568_p4 = pneg %p849_p3  ;;  %s161_s24 = sshll.u32 %s792_s23, 4  ;;  %s162_s24 = int_to_ptr.vmem [resolvable:$true] %s161_s24 }
   0xc   : > { %s645_s27 = scalar_lea.hbm %s1011_s1, 256 }
   0xd   : > { %p859_p5 = pnand %p845_p2, %p568_p4  ;;  %p646_p7 = scmp.ne.s32.totalorder %s1011_s1, %s645_s27 }
   0xe   : > { %p652_p11 = scmp.lt.u32.totalorder %s645_s27, %s1011_s1 }
   0xf   : > { %p876_p8 = pneg %p859_p5 }
  0x11   : > { %p648_p9 = pnand %p876_p8, %p646_p7 }
  0x13   : > { %p649_p10 = pneg %p648_p9 }
  0x15   : > { %p654_p12 = pnand %p652_p11, %p649_p10 }
  0x17   : > { %657 = shalt.err (!%p654_p12)
}
  0x18   : > { %s658_s6 = scalar_lea.vmem %s853_s19, 256  ;;  %p666_p4 = scmp.lt.s32.totalorder %s853_s19, %s853_s19 }
  0x19   : > { %p659_p13 = scmp.ne.s32.totalorder %s853_s19, %s658_s6  ;;  %p667_p2 = scmp.lt.s32.totalorder %s658_s6, %s658_s6 }
  0x1b   : > { %p661_p0 = pnand %p659_p13, %p876_p8  ;;  %p668_p7 = por %p667_p2, %p666_p4 }
  0x1d   : > { %p662_p1 = pneg %p661_p0 }
  0x1f   : > { %p669_p9 = pnand %p668_p7, %p662_p1 }
  0x21   : > { %672 = shalt.err (!%p669_p9)
}
  0x22   : > { %s793_s7 = smov 64   ;;  %s794_s8 = smov 4  }
  0x23   : > { %574 = dma.hbm_to_vmem [thread:$0]  (!%p859_p5), %s1011_s1, 256, %s853_s19, [#allocation8], %s793_s7, %s793_s7, %s794_s8  }
  0x24   : > { %s1028_s21 = smov (%p864_p6, %s31_s21), 0  ;;  %s673_s23 = scalar_lea.hbm %s1010_s0, 128 }
  0x25   : > { %p674_p2 = scmp.ne.s32.totalorder %s1010_s0, %s673_s23  ;;  %p680_p12 = scmp.lt.u32.totalorder %s673_s23, %s1010_s0 }
  0x27   : > { %p676_p10 = pnand %p674_p2, %p876_p8 }
  0x29   : > { %p677_p11 = pneg %p676_p10 }
  0x2b   : > { %p682_p13 = pnand %p680_p12, %p677_p11 }
  0x2d   : > { %685 = shalt.err (!%p682_p13)
}
  0x2e   : > { %s686_s19 = scalar_lea.vmem %s162_s24, 128  ;;  %p694_p4 = scmp.lt.s32.totalorder %s162_s24, %s162_s24 }
  0x2f   : > { %p687_p6 = scmp.ne.s32.totalorder %s162_s24, %s686_s19  ;;  %p695_p7 = scmp.lt.s32.totalorder %s686_s19, %s686_s19 }
  0x31   : > { %p689_p0 = pnand %p687_p6, %p876_p8  ;;  %p696_p9 = por %p695_p7, %p694_p4 }
  0x33   : > { %p690_p1 = pneg %p689_p0 }
  0x35   : > { %p697_p3 = pnand %p696_p9, %p690_p1 }
  0x37   : > { %700 = shalt.err (!%p697_p3)
}
  0x38   : > { %571 = dma.hbm_to_vmem [thread:$0]  (!%p859_p5), %s1010_s0, 128, %s162_s24, [#allocation5], %s793_s7, %s793_s7, %s794_s8  }
  0x39   : > { %s795_s4 = smov [#allocation9]   ;;  %s701_s10 = scalar_lea.hbm %s1012_s2, 16 }
  0x3a   : > { %s192_s5 = sshll.u32 %s795_s4, 4  ;;  %p702_p2 = scmp.ne.s32.totalorder %s1012_s2, %s701_s10  ;;  %s193_s5 = int_to_ptr.vmem [resolvable:$true] %s192_s5 }
  0x3b   : > { %p708_p11 = scmp.lt.u32.totalorder %s701_s10, %s1012_s2 }
  0x3c   : > { %p704_p3 = pnand %p702_p2, %p876_p8 }
  0x3e   : > { %p705_p10 = pneg %p704_p3 }
  0x40   : > { %p710_p12 = pnand %p708_p11, %p705_p10 }
  0x42   : > { %713 = shalt.err (!%p710_p12)
}
  0x43   : > { %s714_s24 = scalar_lea.vmem %s193_s5, 16  ;;  %s721_s7 = scalar_lea.vmem %s193_s5, 32 }
  0x44   : > { %p715_p13 = scmp.ne.s32.totalorder %s193_s5, %s714_s24  ;;  %p722_p1 = scmp.lt.s32.totalorder %s193_s5, %s193_s5 }
  0x45   : > { %p723_p4 = scmp.lt.s32.totalorder %s721_s7, %s714_s24 }
  0x46   : > { %p717_p6 = pnand %p715_p13, %p876_p8 }
  0x47   : > { %p724_p7 = por %p723_p4, %p722_p1 }
  0x48   : > { %p718_p0 = pneg %p717_p6 }
  0x4a   : > { %p725_p9 = pnand %p724_p7, %p718_p0 }
  0x4c   : > { %728 = shalt.err (!%p725_p9)
}
  0x4d   : > { %577 = dma.hbm_to_vmem [thread:$0]  (!%p859_p5), %s1012_s2, 16, %s193_s5, [#allocation8]  }
  0x4e   : > { %p1022_p2 = scmp.ne.s32.totalorder %s1018_s17, 0 }
  0x4f   : > { %p1023_p3 = scmp.ne.s32.totalorder (!%p1022_p2), %s1017_s16, 0 }
  0x50   : > { %205 = sbr.rel (%p1022_p2) target bundleno = 1242 (0x4da), region = 32 }
  0x57   : > { %768 = dma.done.wait (%p1023_p3), [#allocation5], 128  }
  0x58   : > { %770 = vsyncadd (%p1023_p3), [#allocation5], 4294967168 }
  0x59   : > { %772 = dma.done.wait (%p1023_p3), [#allocation8], 272  }
  0x5a   : > { %774 = vsyncadd (%p1023_p3), [#allocation8], 4294967024  ;;  %v538_v0 = vld [vmem:[#allocation4] sm:$0xff]   ;;  %vm234_vm0 = vcmask 261120   ;;  %v624_v15 = vld [vmem:[#allocation7] sm:$0xff]   ;;  %v796_v16 = vmov 0.0  }
  0x5b   : > { %v539_v1 = vunpack.c.l.bf16 %v538_v0  ;;  %v540_v2 = vunpack.c.h.bf16 %v538_v0  ;;  %544 = vmatprep.subr.bf16.mxu0 %v796_v16  ;;  %vm797_vm1 = vmmov 0   ;;  %v625_v17 = vld [vmem:[#allocation7 + $0x8] sm:$0xff]   ;;  %p330_p5 = scmp.eq.s32.totalorder %s781_s12, 0  ;;  %v525_v29 = vld [vmem:[#allocation9] ss:$0 sm:$0xff] }
  0x5c   : > { %548 = vmatprep.mubr.msk.bf16.mxu0 %vm797_vm1, %v796_v16  ;;  %545 = vmatpush3.bf16.msra.mxu0 %v624_v15  ;;  %vm336_vm2 = vcmask (%p330_p5), 7168   ;;  %v798_v36 = vmov (%p330_p5), -inf   ;;  %v799_v37 = vmov (%p330_p5), 0.0  }
  0x5d   : > { %v235_v3 = vsel %vm234_vm0, %v539_v1, 0.0  ;;  %v238_v4 = vsel %vm234_vm0, %v540_v2, 0.0  ;;  %546 = vmatprep.subr.bf16.mxu0 %v796_v16  ;;  %337 = vst.msk [vmem:[#allocation2] sm:$0xff] (%p330_p5), %vm336_vm2, %v798_v36  ;;  %338 = vst.msk [vmem:[#allocation2 + $0x8] sm:$0xff] (%p330_p5), %vm336_vm2, %v798_v36 }
  0x5e   : > { %236 = vadd.xlane.f32.xlu0 %v235_v3  ;;  %339 = vst.msk [vmem:[#allocation3] sm:$0xff] (%p330_p5), %vm336_vm2, %v799_v37  ;;  %340 = vst.msk [vmem:[#allocation3 + $0x8] sm:$0xff] (%p330_p5), %vm336_vm2, %v799_v37 }
  0x60   : > { %547 = vmatpush3.bf16.msra.mxu0 %v625_v17 }
  0x62   : > { %239 = vadd.xlane.f32.xlu0 %v238_v4 }
  0xeb   : > { %v237_v5 = vpop.xlane.xlu0 %236 }
  0xec   : > { %v242_v6 = vmul.f32 0.03125, %v237_v5 }
  0xee   : > { %v244_v7 = vsub.f32 %v539_v1, %v242_v6 }
  0xef   : > { %v240_v8 = vpop.xlane.xlu0 %239 }
  0xf0   : > { %v243_v9 = vmul.f32 0.03125, %v240_v8  ;;  %v246_v10 = vmul.f32 %v244_v7, %v244_v7 }
  0xf2   : > { %v245_v11 = vsub.f32 %v540_v2, %v243_v9  ;;  %v248_v12 = vsel %vm234_vm0, %v246_v10, 0.0 }
  0xf3   : > { %249 = vadd.xlane.f32.xlu1 %v248_v12 }
  0xf4   : > { %v247_v13 = vmul.f32 %v245_v11, %v245_v11 }
  0xf6   : > { %v251_v14 = vsel %vm234_vm0, %v247_v13, 0.0 }
  0xf7   : > { %252 = vadd.xlane.f32.xlu1 %v251_v14 }
 0x180   : > { %v250_v18 = vpop.xlane.xlu1 %249 }
 0x181   : > { %v254_v19 = vmul.f32 0.03125, %v250_v18 }
 0x183   : > { %v256_v20 = vadd.f32 1e-05, %v254_v19 }
 0x184   : > { %v253_v21 = vpop.xlane.xlu1 %252 }
 0x185   : > { %v255_v22 = vmul.f32 0.03125, %v253_v21  ;;  %626 = vrsqrt.f32 %v256_v20 }
 0x187   : > { %v257_v23 = vadd.f32 1e-05, %v255_v22 }
 0x189   : > { %628 = vrsqrt.f32 %v257_v23 }
 0x18f   : > { %v627_v24 = vpop.eup %626 }
 0x190   : > { %v260_v26 = vmul.f32 %v627_v24, %v244_v7 }
 0x193   : > { %v629_v25 = vpop.eup %628 }
 0x194   : > { %v261_v27 = vmul.f32 %v629_v25, %v245_v11 }
 0x196   : > { %v262_v28 = vpack.c.bf16 %v261_v27, %v260_v26 }
 0x198   : > { %549 = vmatmul.mubr.msk.bf16.vlgmr.msra.gmra.mrb[0].mxu0 %vm234_vm0, %v262_v28 }
 0x268   : > { %335 = sbr.rel (!%p330_p5) target bundleno = 623 (0x26f), region = 48 }
 0x26b   : > { %v323_v30 = vpop.f32.mrb[0].mxu0 }
 0x26c   : > { %v953_v31 = vadd.f32 %v525_v29, %v323_v30  ;;  %v550_v32 = vpop.f32.mrb[1].mxu0 }
 0x26d   : > { %v326_v33 = vpop.f32.mrb[2].mxu0 }
 0x26e   : > { %v955_v34 = vadd.f32 %v525_v29, %v326_v33  ;;  %v551_v35 = vpop.f32.mrb[3].mxu0 }
 0x26f PF: > { %p530_p8 = scmp.ne.s32.totalorder %s781_s12, 0 }
 0x270   : > { %vm346_vm3 = vcmask (!%p530_p8), 523264   ;;  %v800_v40 = vmov (!%p530_p8), 0   ;;  %v344_v41 = vld [vmem:[#allocation2] sm:$0xff] (!%p530_p8)  ;;  %vm389_vm4 = vcmask (!%p530_p8), 7168   ;;  %v345_v44 = vld [vmem:[#allocation2 + $0x8] sm:$0xff] (!%p530_p8)  ;;  %v355_v62 = vld [vmem:[#allocation3] sm:$0xff] (!%p530_p8) }
 0x271   : > { %343 = sbr.rel (%p530_p8) target bundleno = 1063 (0x427), region = 52  ;;  %v347_v38 = vsel (!%p530_p8), %vm346_vm3, %v953_v31, -inf  ;;  %v350_v39 = vsel (!%p530_p8), %vm346_vm3, %v955_v34, -inf  ;;  %630 = vset.pattern.permute.xlu1 (!%p530_p8), %v800_v40  ;;  %631 = vset.pattern.permute.xlu0 (!%p530_p8), %v800_v40  ;;  %v356_v2 = vld [vmem:[#allocation3 + $0x8] sm:$0xff] (!%p530_p8) }
 0x272   : > { %348 = vmax.xlane.f32.xlu0 (!%p530_p8), %v347_v38 }
 0x276   : > { %351 = vmax.xlane.f32.xlu0 (!%p530_p8), %v350_v39 }
 0x2ff   : > { %v349_v42 = vpop.xlane.xlu0 %348 }
 0x300   : > { %v353_v43 = vmax.f32 %v344_v41, %v349_v42 }
 0x302   : > { %v357_v45 = vsub.f32 %v344_v41, %v353_v43  ;;  %392 = vst.msk [vmem:[#allocation2] sm:$0xff] %vm389_vm4, %v353_v43  ;;  %367 = vperm.xlu1 %630, %v353_v43  }
 0x303   : > { %v352_v46 = vpop.xlane.xlu0 %351 }
 0x304   : > { %v354_v47 = vmax.f32 %v345_v44, %v352_v46  ;;  %v359_v59 = vmul.f32 1.442695, %v357_v45 }
 0x306   : > { %v358_v48 = vsub.f32 %v345_v44, %v354_v47  ;;  %393 = vst.msk [vmem:[#allocation2 + $0x8] sm:$0xff] %vm389_vm4, %v354_v47  ;;  %372 = vperm.xlu1 %630, %v354_v47  }
 0x308   : > { %v361_v60 = vmul.f32 1.442695, %v358_v48 }
 0x381   : > { %v368_v49 = vpop.permute.xlu1 %367 }
 0x382   : > { %v375_v50 = vsub.f32 %v953_v31, %v368_v49 }
 0x384   : > { %v377_v51 = vmul.f32 1.442695, %v375_v50 }
 0x385   : > { %v373_v52 = vpop.permute.xlu1 %372 }
 0x386   : > { %632 = vpow2.f32 %v377_v51  ;;  %v376_v53 = vsub.f32 %v955_v34, %v373_v52 }
 0x388   : > { %v379_v54 = vmul.f32 1.442695, %v376_v53 }
 0x38a   : > { %634 = vpow2.f32 %v379_v54 }
 0x38b   : > { %636 = vpow2.f32 %v359_v59 }
 0x38c   : > { %638 = vpow2.f32 %v361_v60 }
 0x390   : > { %v633_v55 = vpop.eup %632 }
 0x391   : > { %v381_v56 = vsel %vm346_vm3, %v633_v55, 0.0 }
 0x392   : > { %382 = vadd.xlane.f32.xlu0 %v381_v56 }
 0x394   : > { %v635_v57 = vpop.eup %634 }
 0x395   : > { %v384_v58 = vsel %vm346_vm3, %v635_v57, 0.0  ;;  %v637_v61 = vpop.eup %636 }
 0x396   : > { %385 = vadd.xlane.f32.xlu1 %v384_v58  ;;  %v363_v63 = vmul.f32 %v637_v61, %v355_v62  ;;  %v639_v0 = vpop.eup %638 }
 0x397   : > { %v364_v4 = vmul.f32 %v639_v0, %v356_v2 }
 0x41f   : > { %v383_v1 = vpop.xlane.xlu0 %382 }
 0x420   : > { %v387_v3 = vadd.f32 %v383_v1, %v363_v63 }
 0x422   : > { %390 = vst.msk [vmem:[#allocation3] sm:$0xff] %vm389_vm4, %v387_v3 }
 0x423   : > { %v386_v5 = vpop.xlane.xlu1 %385 }
 0x424   : > { %v388_v6 = vadd.f32 %v386_v5, %v364_v4 }
 0x426   : > { %391 = vst.msk [vmem:[#allocation3 + $0x8] sm:$0xff] %vm389_vm4, %v388_v6 }
 0x427 PF: > { %p531_p10 = scmp.ne.s32.totalorder %s781_s12, 1 }
 0x428   : > { %v801_v8 = vmov (!%p531_p10), 0   ;;  %v398_v11 = vld [vmem:[#allocation2] sm:$0xff] (!%p531_p10)  ;;  %v399_v14 = vld [vmem:[#allocation2 + $0x8] sm:$0xff] (!%p531_p10)  ;;  %vm420_vm5 = vcmask (!%p531_p10), 523264  }
 0x429   : > { %397 = sbr.rel (%p531_p10) target bundleno = 1216 (0x4c0), region = 56  ;;  %v400_v7 = vld [vmem:[#allocation3] sm:$0xff] (!%p531_p10)  ;;  %640 = vset.pattern.permute.xlu0 (!%p531_p10), %v801_v8 }
 0x42a   : > { %641 = vlog2.f32 (!%p531_p10), %v400_v7 }
 0x42d   : > { %v401_v9 = vld [vmem:[#allocation3 + $0x8] sm:$0xff] (!%p531_p10) }
 0x42e   : > { %643 = vlog2.f32 (!%p531_p10), %v401_v9 }
 0x434   : > { %v642_v10 = vpop.eup %641 }
 0x435   : > { %v403_v13 = vmul.f32 0.6931472, %v642_v10 }
 0x437   : > { %v406_v16 = vadd.f32 %v403_v13, %v398_v11 }
 0x438   : > { %v644_v12 = vpop.eup %643 }
 0x439   : > { %v405_v15 = vmul.f32 0.6931472, %v644_v12  ;;  %410 = vperm.xlu0 %640, %v406_v16  }
 0x43b   : > { %v407_v17 = vadd.f32 %v405_v15, %v399_v14 }
 0x43d   : > { %415 = vperm.xlu0 %640, %v407_v17  }
 0x4b8   : > { %v411_v18 = vpop.permute.xlu0 %410 }
 0x4b9   : > { %v418_v19 = vsub.f32 %v953_v31, %v411_v18 }
 0x4bb   : > { %421 = vst.msk [vmem:[#allocation10] sm:$0xff] %vm420_vm5, %v418_v19 }
 0x4bc   : > { %v416_v20 = vpop.permute.xlu0 %415 }
 0x4bd   : > { %v419_v21 = vsub.f32 %v955_v34, %v416_v20 }
 0x4bf   : > { %422 = vst.msk [vmem:[#allocation10 + $0x8] sm:$0xff] %vm420_vm5, %v419_v21 }
 0x4c0 PF: > { %p975_p11 = scmp.eq.s32.totalorder %s516_s15, 1  ;;  %s802_s16 = smov [#allocation10]  }
 0x4c1   : > { %s433_s17 = sshll.u32 %s802_s16, 4  ;;  %s434_s17 = int_to_ptr.vmem [resolvable:$true] %s433_s17 }
 0x4c2   : > { %s729_s20 = scalar_lea.vmem %s434_s17, 256  ;;  %p736_p0 = scmp.lt.s32.totalorder %s434_s17, %s434_s17 }
 0x4c3   : > { %p730_p12 = scmp.ne.s32.totalorder %s434_s17, %s729_s20  ;;  %p737_p1 = scmp.lt.s32.totalorder %s729_s20, %s729_s20 }
 0x4c5   : > { %p731_p13 = pnand %p730_p12, %p975_p11  ;;  %p738_p4 = por %p737_p1, %p736_p0 }
 0x4c7   : > { %p732_p6 = pneg %p731_p13 }
 0x4c9   : > { %p739_p7 = pnand %p738_p4, %p732_p6 }
 0x4cb   : > { %742 = shalt.err (!%p739_p7)
}
 0x4cc   : > { %s743_s15 = scalar_lea.hbm %s1013_s3, 256 }
 0x4cd   : > { %p744_p9 = scmp.ne.s32.totalorder %s1013_s3, %s743_s15  ;;  %p749_p5 = scmp.lt.u32.totalorder %s743_s15, %s1013_s3 }
 0x4cf   : > { %p745_p2 = pnand %p744_p9, %p975_p11 }
 0x4d1   : > { %p746_p3 = pneg %p745_p2 }
 0x4d3   : > { %p751_p8 = pnand %p749_p5, %p746_p3 }
 0x4d5   : > { %754 = shalt.err (!%p751_p8)
}
 0x4d6   : > { %s803_s4 = smov 128   ;;  %s804_s5 = smov 8  }
 0x4d7   : > { %565 = dma.vmem_to_hbm [thread:$0]  (%p975_p11), %s434_s17, 256, %s1013_s3, [#allocation6], %s803_s4, %s803_s4, %s804_s5  }
 0x4d8   : > { %776 = dma.done.wait (%p975_p11), [#allocation6], 256  }
 0x4d9   : > { %778 = vsyncadd (%p975_p11), [#allocation6], 4294967040 }
 0x4da PF: > { %s16_s14 = sadd.s32 1, %s789_s14   ;;  %s1025_s12 = smov %s785_s13 }
 0x4db   : > { %p13_p10 = scmp.ge.s32.totalorder %s16_s14, 4   ;;  %s1026_s13 = smov %s1028_s21 }
 0x4dd   :  { %15 = sbr.rel (!%p13_p10) target bundleno = 4 (0x4), region = 85 }
 0x4e4   :  { %449 = vsyncpa [#allocation5], 1 }
 0x4e5   :  { %451 = vsyncpa [#allocation5 + $0x1], 1 }
 0x4e6   :  { %452 = vsyncpa [#allocation8], 1 }
 0x4e7   :  { %453 = vsyncpa [#allocation6], 1 }
 0x4e8   :  { %455 = vsyncpa [#allocation6 + $0x1], 1 }

// kernel: transformer_forward.3
= control target key start
LH: loop header
LB: loop body
LE: loop exit
PB: predicated region body
PF: predicated region fallthrough
CT: control target
= control target key end

     0   :  { %14 = vsyncpa [#allocation3], 0  ;;  %s2955_s0 = inlined_call_operand.hbm [shape: bf16[2,8,32], index: 0, kind: input, shape index: {}]   ;;  %s2956_s1 = inlined_call_operand.hbm [shape: bf16[32,96], index: 1, kind: input, shape index: {}]   ;;  %s2957_s2 = inlined_call_operand.hbm [shape: f32[1,96], index: 2, kind: input, shape index: {}]   ;;  %s2958_s3 = inlined_call_operand.hbm [shape: bf16[32,32], index: 3, kind: input, shape index: {}]   ;;  %s2959_s4 = inlined_call_operand.hbm [shape: f32[1,32], index: 4, kind: input, shape index: {}]   ;;  %s2960_s5 = inlined_call_operand.hbm [shape: bf16[32,64], index: 5, kind: input, shape index: {}]   ;;  %s2961_s6 = inlined_call_operand.hbm [shape: f32[1,64], index: 6, kind: input, shape index: {}]   ;;  %s2962_s7 = inlined_call_operand.hbm [shape: bf16[64,32], index: 7, kind: input, shape index: {}]   ;;  %s2963_s8 = inlined_call_operand.hbm [shape: f32[1,32], index: 8, kind: input, shape index: {}]   ;;  %s2964_s9 = inlined_call_operand.hbm [shape: bf16[2,8,32], index: 9, kind: output, shape index: {}]  }
   0x1   :  { %15 = vsyncpa [#allocation6], 0 }
   0x2   :  { %16 = vsyncpa [#allocation9], 0 }
   0x3   :  { %17 = vsyncpa [#allocation12], 0 }
   0x4   :  { %18 = vsyncpa [#allocation15], 0 }
   0x5   :  { %19 = vsyncpa [#allocation4], 0  ;;  %s2375_s30 = smov [#allocation5]   ;;  %s2376_s11 = smov [#allocation8]  }
   0x6   :  { %s37_s10 = sshll.u32 %s2375_s30, 4  ;;  %s59_s12 = sshll.u32 %s2376_s11, 4  ;;  %s38_s10 = int_to_ptr.vmem [resolvable:$true] %s37_s10  ;;  %s2452_s12 = int_to_ptr.vmem [resolvable:$true] %s59_s12 }
   0x7   :  { %s2143_s15 = scalar_lea.hbm %s2956_s1, 256 }
   0x8   :  { %p2144_p0 = scmp.ne.s32.totalorder %s2956_s1, %s2143_s15  ;;  %p2147_p1 = scmp.lt.u32.totalorder %s2143_s15, %s2956_s1 }
   0xa   :  { %p2149_p2 = pnand %p2147_p1, %p2144_p0 }
   0xc   :  { %2152 = shalt.err (!%p2149_p2)
}
   0xd   :  { %s2153_s20 = scalar_lea.vmem %s38_s10, 256  ;;  %p2158_p4 = scmp.lt.s32.totalorder %s38_s10, %s38_s10 }
   0xe   :  { %p2154_p3 = scmp.ne.s32.totalorder %s38_s10, %s2153_s20  ;;  %p2159_p5 = scmp.lt.s32.totalorder %s2153_s20, %s2153_s20 }
  0x10   :  { %p2160_p6 = por %p2159_p5, %p2158_p4 }
  0x12   :  { %p2161_p7 = pnand %p2160_p6, %p2154_p3 }
  0x14   :  { %2164 = shalt.err (!%p2161_p7)
}
  0x15   :  { %s2377_s21 = smov 64   ;;  %s2378_s22 = smov 4  }
  0x16   :  { %43 = dma.hbm_to_vmem [thread:$0]  %s2956_s1, 256, %s38_s10, [#allocation6], %s2377_s21, %s2377_s21, %s2378_s22  }
  0x17   :  { %s2165_s27 = scalar_lea.hbm %s2958_s3, 256 }
  0x18   :  { %p2166_p8 = scmp.ne.s32.totalorder %s2958_s3, %s2165_s27  ;;  %p2169_p9 = scmp.lt.u32.totalorder %s2165_s27, %s2958_s3 }
  0x1a   :  { %p2171_p10 = pnand %p2169_p9, %p2166_p8 }
  0x1c   :  { %2174 = shalt.err (!%p2171_p10)
}
  0x1d   :  { %s2175_s13 = scalar_lea.vmem %s2452_s12, 256  ;;  %p2180_p12 = scmp.lt.s32.totalorder %s2452_s12, %s2452_s12 }
  0x1e   :  { %p2176_p11 = scmp.ne.s32.totalorder %s2452_s12, %s2175_s13  ;;  %p2181_p13 = scmp.lt.s32.totalorder %s2175_s13, %s2175_s13 }
  0x20   :  { %p2182_p0 = por %p2181_p13, %p2180_p12 }
  0x22   :  { %p2183_p1 = pnand %p2182_p0, %p2176_p11 }
  0x24   :  { %2186 = shalt.err (!%p2183_p1)
}
  0x25   :  { %65 = dma.hbm_to_vmem [thread:$0]  %s2958_s3, 256, %s2452_s12, [#allocation9], %s2377_s21, %s2377_s21, %s2378_s22  }
  0x26   :  { %s2379_s14 = smov [#allocation11]   ;;  %s2380_s16 = smov [#allocation14]  }
  0x27   :  { %s81_s15 = sshll.u32 %s2379_s14, 4  ;;  %s103_s17 = sshll.u32 %s2380_s16, 4  ;;  %s82_s15 = int_to_ptr.vmem [resolvable:$true] %s81_s15  ;;  %s2489_s17 = int_to_ptr.vmem [resolvable:$true] %s103_s17 }
  0x28   :  { %s2187_s20 = scalar_lea.hbm %s2960_s5, 256 }
  0x29   :  { %p2188_p2 = scmp.ne.s32.totalorder %s2960_s5, %s2187_s20  ;;  %p2191_p3 = scmp.lt.u32.totalorder %s2187_s20, %s2960_s5 }
  0x2b   :  { %p2193_p4 = pnand %p2191_p3, %p2188_p2 }
  0x2d   :  { %2196 = shalt.err (!%p2193_p4)
}
  0x2e   :  { %s2197_s3 = scalar_lea.vmem %s82_s15, 256  ;;  %p2202_p6 = scmp.lt.s32.totalorder %s82_s15, %s82_s15 }
  0x2f   :  { %p2198_p5 = scmp.ne.s32.totalorder %s82_s15, %s2197_s3  ;;  %p2203_p7 = scmp.lt.s32.totalorder %s2197_s3, %s2197_s3 }
  0x31   :  { %p2204_p8 = por %p2203_p7, %p2202_p6 }
  0x33   :  { %p2205_p9 = pnand %p2204_p8, %p2198_p5 }
  0x35   :  { %2208 = shalt.err (!%p2205_p9)
}
  0x36   :  { %87 = dma.hbm_to_vmem [thread:$0]  %s2960_s5, 256, %s82_s15, [#allocation12], %s2377_s21, %s2377_s21, %s2378_s22  }
  0x37   :  { %s2209_s30 = scalar_lea.hbm %s2962_s7, 512 }
  0x38   :  { %p2210_p10 = scmp.ne.s32.totalorder %s2962_s7, %s2209_s30  ;;  %p2213_p11 = scmp.lt.u32.totalorder %s2209_s30, %s2962_s7 }
  0x3a   :  { %p2215_p12 = pnand %p2213_p11, %p2210_p10 }
  0x3c   :  { %2218 = shalt.err (!%p2215_p12)
}
  0x3d   :  { %s2219_s14 = scalar_lea.vmem %s2489_s17, 512  ;;  %p2224_p0 = scmp.lt.s32.totalorder %s2489_s17, %s2489_s17 }
  0x3e   :  { %p2220_p13 = scmp.ne.s32.totalorder %s2489_s17, %s2219_s14  ;;  %p2225_p1 = scmp.lt.s32.totalorder %s2219_s14, %s2219_s14 }
  0x40   :  { %p2226_p2 = por %p2225_p1, %p2224_p0 }
  0x42   :  { %p2227_p3 = pnand %p2226_p2, %p2220_p13 }
  0x44   :  { %2230 = shalt.err (!%p2227_p3)
}
  0x45   :  { %109 = dma.hbm_to_vmem [thread:$0]  %s2962_s7, 512, %s2489_s17, [#allocation15], %s2377_s21, %s2377_s21, %s2378_s22  }
  0x46   :  { %s2381_s16 = smov [#allocation2]   ;;  %s2382_s19 = smov [#allocation7]  }
  0x47   :  { %s25_s18 = sshll.u32 %s2381_s16, 4  ;;  %s50_s20 = sshll.u32 %s2382_s19, 4  ;;  %s26_s18 = int_to_ptr.vmem [resolvable:$true] %s25_s18  ;;  %s51_s20 = int_to_ptr.vmem [resolvable:$true] %s50_s20 }
  0x48   :  { %s2231_s25 = scalar_lea.hbm %s2955_s0, 128 }
  0x49   :  { %p2232_p4 = scmp.ne.s32.totalorder %s2955_s0, %s2231_s25  ;;  %p2235_p5 = scmp.lt.u32.totalorder %s2231_s25, %s2955_s0 }
  0x4b   :  { %p2237_p6 = pnand %p2235_p5, %p2232_p4 }
  0x4d   :  { %2240 = shalt.err (!%p2237_p6)
}
  0x4e   :  { %s2241_s7 = scalar_lea.vmem %s26_s18, 128  ;;  %p2246_p8 = scmp.lt.s32.totalorder %s26_s18, %s26_s18 }
  0x4f   :  { %p2242_p7 = scmp.ne.s32.totalorder %s26_s18, %s2241_s7  ;;  %p2247_p9 = scmp.lt.s32.totalorder %s2241_s7, %s2241_s7 }
  0x51   :  { %p2248_p10 = por %p2247_p9, %p2246_p8 }
  0x53   :  { %p2249_p11 = pnand %p2248_p10, %p2242_p7 }
  0x55   :  { %2252 = shalt.err (!%p2249_p11)
}
  0x56   :  { %31 = dma.hbm_to_vmem [thread:$0]  %s2955_s0, 128, %s26_s18, [#allocation3], %s2377_s21, %s2377_s21, %s2378_s22  }
  0x57   :  { %s2253_s11 = scalar_lea.hbm %s2957_s2, 16 }
  0x58   :  { %p2254_p12 = scmp.ne.s32.totalorder %s2957_s2, %s2253_s11  ;;  %p2257_p13 = scmp.lt.u32.totalorder %s2253_s11, %s2957_s2 }
  0x5a   :  { %p2259_p0 = pnand %p2257_p13, %p2254_p12 }
  0x5c   :  { %2262 = shalt.err (!%p2259_p0)
}
  0x5d   :  { %s2263_s5 = scalar_lea.vmem %s51_s20, 16  ;;  %s2267_s15 = scalar_lea.vmem %s51_s20, 32 }
  0x5e   :  { %p2264_p1 = scmp.ne.s32.totalorder %s51_s20, %s2263_s5  ;;  %p2268_p2 = scmp.lt.s32.totalorder %s51_s20, %s51_s20 }
  0x5f   :  { %p2269_p3 = scmp.lt.s32.totalorder %s2267_s15, %s2263_s5 }
  0x61   :  { %p2270_p4 = por %p2269_p3, %p2268_p2 }
  0x63   :  { %p2271_p5 = pnand %p2270_p4, %p2264_p1 }
  0x65   :  { %2274 = shalt.err (!%p2271_p5)
}
  0x66   :  { %53 = dma.hbm_to_vmem [thread:$0]  %s2957_s2, 16, %s51_s20, [#allocation6]  }
  0x67   :  { %s2383_s18 = smov [#allocation10]   ;;  %s2384_s23 = smov [#allocation13]  }
  0x68   :  { %s72_s19 = sshll.u32 %s2383_s18, 4  ;;  %s94_s24 = sshll.u32 %s2384_s23, 4  ;;  %s73_s19 = int_to_ptr.vmem [resolvable:$true] %s72_s19  ;;  %s95_s24 = int_to_ptr.vmem [resolvable:$true] %s94_s24 }
  0x69   :  { %s2275_s3 = scalar_lea.hbm %s2959_s4, 16 }
  0x6a   :  { %p2276_p6 = scmp.ne.s32.totalorder %s2959_s4, %s2275_s3  ;;  %p2279_p7 = scmp.lt.u32.totalorder %s2275_s3, %s2959_s4 }
  0x6c   :  { %p2281_p8 = pnand %p2279_p7, %p2276_p6 }
  0x6e   :  { %2284 = shalt.err (!%p2281_p8)
}
  0x6f   :  { %s2285_s2 = scalar_lea.vmem %s73_s19, 16  ;;  %s2289_s20 = scalar_lea.vmem %s73_s19, 32 }
  0x70   :  { %p2286_p9 = scmp.ne.s32.totalorder %s73_s19, %s2285_s2  ;;  %p2290_p10 = scmp.lt.s32.totalorder %s73_s19, %s73_s19 }
  0x71   :  { %p2291_p11 = scmp.lt.s32.totalorder %s2289_s20, %s2285_s2 }
  0x73   :  { %p2292_p12 = por %p2291_p11, %p2290_p10 }
  0x75   :  { %p2293_p13 = pnand %p2292_p12, %p2286_p9 }
  0x77   :  { %2296 = shalt.err (!%p2293_p13)
}
  0x78   :  { %75 = dma.hbm_to_vmem [thread:$0]  %s2959_s4, 16, %s73_s19, [#allocation9]  }
  0x79   :  { %s2297_s13 = scalar_lea.hbm %s2961_s6, 16 }
  0x7a   :  { %p2298_p0 = scmp.ne.s32.totalorder %s2961_s6, %s2297_s13  ;;  %p2301_p1 = scmp.lt.u32.totalorder %s2297_s13, %s2961_s6 }
  0x7c   :  { %p2303_p2 = pnand %p2301_p1, %p2298_p0 }
  0x7e   :  { %2306 = shalt.err (!%p2303_p2)
}
  0x7f   :  { %s2307_s15 = scalar_lea.vmem %s95_s24, 16  ;;  %s2311_s0 = scalar_lea.vmem %s95_s24, 32 }
  0x80   :  { %p2308_p3 = scmp.ne.s32.totalorder %s95_s24, %s2307_s15  ;;  %p2312_p4 = scmp.lt.s32.totalorder %s95_s24, %s95_s24 }
  0x81   :  { %p2313_p5 = scmp.lt.s32.totalorder %s2311_s0, %s2307_s15 }
  0x83   :  { %p2314_p6 = por %p2313_p5, %p2312_p4 }
  0x85   :  { %p2315_p7 = pnand %p2314_p6, %p2308_p3 }
  0x87   :  { %2318 = shalt.err (!%p2315_p7)
}
  0x88   :  { %97 = dma.hbm_to_vmem [thread:$0]  %s2961_s6, 16, %s95_s24, [#allocation12]  }
  0x89   :  { %s2385_s18 = smov [#allocation16]   ;;  %s2319_s26 = scalar_lea.hbm %s2963_s8, 16 }
  0x8a   :  { %s116_s19 = sshll.u32 %s2385_s18, 4  ;;  %p2320_p8 = scmp.ne.s32.totalorder %s2963_s8, %s2319_s26  ;;  %s117_s19 = int_to_ptr.vmem [resolvable:$true] %s116_s19 }
  0x8b   :  { %p2323_p9 = scmp.lt.u32.totalorder %s2319_s26, %s2963_s8 }
  0x8d   :  { %p2325_p10 = pnand %p2323_p9, %p2320_p8 }
  0x8f   :  { %2328 = shalt.err (!%p2325_p10)
}
  0x90   :  { %s2329_s17 = scalar_lea.vmem %s117_s19, 16  ;;  %s2333_s6 = scalar_lea.vmem %s117_s19, 32 }
  0x91   :  { %p2330_p11 = scmp.ne.s32.totalorder %s117_s19, %s2329_s17  ;;  %p2334_p12 = scmp.lt.s32.totalorder %s117_s19, %s117_s19 }
  0x92   :  { %p2335_p13 = scmp.lt.s32.totalorder %s2333_s6, %s2329_s17 }
  0x94   :  { %p2336_p0 = por %p2335_p13, %p2334_p12 }
  0x96   :  { %p2337_p1 = pnand %p2336_p0, %p2330_p11 }
  0x98   :  { %2340 = shalt.err (!%p2337_p1)
}
  0x99   :  { %119 = dma.hbm_to_vmem [thread:$0]  %s2963_s8, 16, %s117_s19, [#allocation15]  }
  0x9a   :  { %2363 = dma.done.wait [#allocation3], 128  }
  0x9b   :  { %2364 = vsyncadd [#allocation3], 4294967168 }
  0x9c   :  { %2365 = dma.done.wait [#allocation6], 272  }
  0x9d   :  { %2366 = vsyncadd [#allocation6], 4294967024 }
  0x9e   :  { %2367 = dma.done.wait [#allocation9], 272  }
  0x9f   :  { %2368 = vsyncadd [#allocation9], 4294967024 }
  0xa0   :  { %2369 = dma.done.wait [#allocation12], 272  }
  0xa1   :  { %2370 = vsyncadd [#allocation12], 4294967024 }
  0xa2   :  { %2371 = dma.done.wait [#allocation15], 528  }
  0xa3   :  { %2372 = vsyncadd [#allocation15], 4294966768  ;;  %v2386_v0 = vmov 0.0   ;;  %vm2387_vm0 = vmmov 0   ;;  %v2058_v1 = vld [vmem:[#allocation5] sm:$0xff]   ;;  %v2059_v2 = vld [vmem:[#allocation5 + $0x8] sm:$0xff]  }
  0xa4   :  { %1899 = vmatprep.subr.bf16.mxu0 %v2386_v0  ;;  %1903 = vmatprep.mubr.msk.bf16.mxu0 %vm2387_vm0, %v2386_v0  ;;  %v148_v3 = vld [vmem:[#allocation2] sm:$0xff]   ;;  %vm176_vm1 = vcmask 261120   ;;  %v1818_v4 = vld [vmem:[#allocation7] ss:$0 sm:$0xff]  ;;  %s2388_s8 = smov 96   ;;  %vm226_vm2 = vcmask 64512  }
  0xa5   :  { %1907 = vmatprep.subr.bf16.mxu1 %v2386_v0  ;;  %1909 = vmatprep.mubr.msk.bf16.mxu1 %vm2387_vm0, %v2386_v0  ;;  %s2389_s20 = smov 88   ;;  %s2390_s28 = smov 120   ;;  %vm436_vm4 = vcmask 1043456   ;;  %vm1497_vm5 = vcmask 130048   ;;  %vm1502_vm6 = vcmask 195584   ;;  %vm1718_vm7 = vcmask 523264  }
  0xa6   :  { %1900 = vmatpush3.bf16.msra.mxu0 %v2058_v1  ;;  %s2391_s29 = smov 80   ;;  %s2392_s30 = smov 112   ;;  %vm1793_vm8 = vcmask 257024  }
  0xa7   :  { %1901 = vmatprep.subr.bf16.mxu0 %v2386_v0  ;;  %s2393_s11 = smov 56   ;;  %s2394_s13 = smov 72  }
  0xa8   :  { %s2395_s1 = smov 104   ;;  %s2396_s10 = smov 48  }
  0xa9   :  { %s2397_s14 = smov 40   ;;  %s2398_s5 = smov 8  }
  0xaa   :  { %1902 = vmatpush3.bf16.msra.mxu0 %v2059_v2  ;;  %s2399_s15 = smov 16   ;;  %s2400_s0 = smov 24  }
  0xab   :  { %1913 = vmatprep.subr.bf16.mxu0 %v2386_v0  ;;  %s2401_s4 = smov [#allocation17]  }
  0xac   :  { %s1801_s16 = sshll.u32 %s2401_s4, 4  ;;  %s1802_s16 = int_to_ptr.vmem [resolvable:$true] %s1801_s16 }
  0xad   :  { %1904 = vmatmul.mubr.msk.bf16.vlgmr.msra.gmra.mrb[0].mxu0 %vm176_vm1, %v148_v3  ;;  %s2341_s18 = scalar_lea.vmem %s1802_s16, 128  ;;  %p2346_p3 = scmp.lt.s32.totalorder %s1802_s16, %s1802_s16 }
  0xae   :  { %1915 = vmatprep.mubr.msk.bf16.mxu0 %vm2387_vm0, %v2386_v0  ;;  %p2342_p2 = scmp.ne.s32.totalorder %s1802_s16, %s2341_s18  ;;  %p2347_p4 = scmp.lt.s32.totalorder %s2341_s18, %s2341_s18 }
  0xb0   :  { %p2348_p5 = por %p2347_p4, %p2346_p3 }
  0xb2   :  { %p2349_p6 = pnand %p2348_p5, %p2342_p2 }
 0x180   :  { %v214_v5 = vpop.f32.mrb[0].mxu0 }
 0x181   :  { %v2600_v6 = vadd.f32 %v1818_v4, %v214_v5  ;;  %v1905_v7 = vpop.f32.mrb[1].mxu0 }
 0x182   :  { %v217_v8 = vpop.f32.mrb[2].mxu0 }
 0x183   :  { %258 = vrot.lane.b32.xlu0 %v2600_v6, %s2388_s8  ;;  %v1906_v9 = vpop.f32.mrb[3].mxu0  ;;  %v2604_v10 = vadd.f32 %v1818_v4, %v217_v8  ;;  %v227_v23 = vsel %vm226_vm2, %v2600_v6, 0.0 }
 0x185   :  { %v230_v24 = vsel %vm226_vm2, %v2604_v10, 0.0 }
 0x187   :  { %260 = vrot.lane.b32.xlu0 %v2604_v10, %s2388_s8 }
 0x1f5   :  { %v259_v11 = vpop.permute.xlu0 %258 }
 0x1f6   :  { %v264_v12 = vsel %vm226_vm2, %v259_v11, 0.0 }
 0x1f7   :  { %265 = vadd.xlane.f32.xlu1 %v264_v12 }
 0x1f9   :  { %v261_v13 = vpop.permute.xlu0 %260 }
 0x1fa   :  { %v267_v14 = vsel %vm226_vm2, %v261_v13, 0.0 }
 0x1fb   :  { %268 = vadd.xlane.f32.xlu1 %v267_v14 }
 0x284   :  { %v266_v15 = vpop.xlane.xlu1 %265 }
 0x285   :  { %v270_v16 = vmul.f32 0.125, %v266_v15 }
 0x287   :  { %v272_v17 = vsub.f32 %v2600_v6, %v270_v16 }
 0x288   :  { %v269_v18 = vpop.xlane.xlu1 %268 }
 0x289   :  { %v271_v19 = vmul.f32 0.125, %v269_v18  ;;  %v274_v20 = vmul.f32 %v272_v17, %v272_v17 }
 0x28b   :  { %v273_v21 = vsub.f32 %v2604_v10, %v271_v19  ;;  %278 = vrot.lane.b32.xlu0 %v274_v20, %s2388_s8 }
 0x28d   :  { %v275_v22 = vmul.f32 %v273_v21, %v273_v21 }
 0x28f   :  { %280 = vrot.lane.b32.xlu1 %v275_v22, %s2388_s8 }
 0x2aa   :  { %228 = vadd.xlane.f32.xlu0 %v227_v23 }
 0x2b3   :  { %231 = vadd.xlane.f32.xlu1 %v230_v24 }
 0x2fd   :  { %v279_v25 = vpop.permute.xlu0 %278 }
 0x2fe   :  { %v284_v26 = vsel %vm226_vm2, %v279_v25, 0.0 }
 0x2ff   :  { %285 = vadd.xlane.f32.xlu0 %v284_v26 }
 0x301   :  { %v281_v27 = vpop.permute.xlu1 %280 }
 0x302   :  { %v287_v28 = vsel %vm226_vm2, %v281_v27, 0.0 }
 0x303   :  { %288 = vadd.xlane.f32.xlu0 %v287_v28 }
 0x337   :  { %v229_v29 = vpop.xlane.xlu0 %228 }
 0x338   :  { %v234_v30 = vmul.f32 0.125, %v229_v29 }
 0x33a   :  { %v236_v31 = vsub.f32 %v2600_v6, %v234_v30 }
 0x33c   :  { %v238_v32 = vmul.f32 %v236_v31, %v236_v31 }
 0x33e   :  { %v240_v33 = vsel %vm226_vm2, %v238_v32, 0.0  ;;  %v221_v32 = vlaneseq }
 0x33f   :  { %241 = vadd.xlane.f32.xlu0 %v240_v33 }
 0x340   :  { %v232_v34 = vpop.xlane.xlu1 %231  ;;  %v222_v33 = vshrl.u32 %v221_v32, 7 }
 0x341   :  { %v235_v35 = vmul.f32 0.125, %v232_v34  ;;  %v224_v34 = vand.u32 127, %v221_v32 }
 0x343   :  { %v237_v36 = vsub.f32 %v2604_v10, %v235_v35  ;;  %vm2672_vm3 = vcmp.le.s32.totalorder %v224_v34, %v222_v33 }
 0x345   :  { %v239_v37 = vmul.f32 %v237_v36, %v237_v36 }
 0x347   :  { %v243_v38 = vsel %vm226_vm2, %v239_v37, 0.0 }
 0x348   :  { %244 = vadd.xlane.f32.xlu0 %v243_v38 }
 0x38c   :  { %v286_v39 = vpop.xlane.xlu0 %285 }
 0x38d   :  { %v290_v40 = vmul.f32 0.125, %v286_v39 }
 0x38f   :  { %v292_v41 = vadd.f32 1e-05, %v290_v40 }
 0x390   :  { %v289_v42 = vpop.xlane.xlu0 %288 }
 0x391   :  { %2070 = vrsqrt.f32 %v292_v41  ;;  %v291_v43 = vmul.f32 0.125, %v289_v42 }
 0x393   :  { %v293_v44 = vadd.f32 1e-05, %v291_v43 }
 0x395   :  { %2072 = vrsqrt.f32 %v293_v44 }
 0x39b   :  { %v2071_v45 = vpop.eup %2070 }
 0x39c   :  { %v296_v46 = vmul.f32 %v2071_v45, %v272_v17 }
 0x39e   :  { %v300_v47 = vpack.c.bf16 %v296_v46, %v296_v46 }
 0x39f   :  { %v2073_v48 = vpop.eup %2072 }
 0x3a0   :  { %303 = vrot.lane.b32.xlu0 %v300_v47, %s2388_s8  ;;  %v297_v49 = vmul.f32 %v2073_v48, %v273_v21 }
 0x3a2   :  { %v301_v50 = vpack.c.bf16 %v297_v49, %v297_v49 }
 0x3a4   :  { %352 = vrot.lane.b32.xlu1 %v301_v50, %s2388_s8  ;;  %575 = vrot.lane.b32.xlu0 %v2604_v10, %s2389_s20 }
 0x3a8   :  { %573 = vrot.lane.b32.xlu1 %v2600_v6, %s2389_s20  ;;  %533 = vrot.lane.b32.xlu0 %v2604_v10, %s2390_s28 }
 0x3ac   :  { %531 = vrot.lane.b32.xlu1 %v2600_v6, %s2390_s28 }
 0x3cc   :  { %v242_v51 = vpop.xlane.xlu0 %241 }
 0x3cd   :  { %v246_v52 = vmul.f32 0.125, %v242_v51 }
 0x3cf   :  { %v248_v54 = vadd.f32 1e-05, %v246_v52 }
 0x3d1   :  { %2074 = vrsqrt.f32 %v248_v54 }
 0x3d5   :  { %v245_v53 = vpop.xlane.xlu0 %244 }
 0x3d6   :  { %v247_v55 = vmul.f32 0.125, %v245_v53 }
 0x3d8   :  { %v249_v56 = vadd.f32 1e-05, %v247_v55 }
 0x3da   :  { %2076 = vrsqrt.f32 %v249_v56  ;;  %v2688_v56 = vpack.c.bf16 %v2604_v10, %v2604_v10 }
 0x3db   :  { %v2075_v57 = vpop.eup %2074 }
 0x3dc   :  { %v252_v58 = vmul.f32 %v2075_v57, %v236_v31  ;;  %v2694_v57 = vpack.c.bf16 %v2600_v6, %v2600_v6 }
 0x3de   :  { %v254_v62 = vmul.f32 0.35355338, %v252_v58 }
 0x3e0   :  { %v298_v5 = vpack.c.bf16 %v254_v62, %v254_v62 }
 0x3e4   :  { %v2077_v59 = vpop.eup %2076 }
 0x3e5   :  { %v253_v63 = vmul.f32 %v2077_v59, %v237_v36 }
 0x3e7   :  { %v255_v7 = vmul.f32 0.35355338, %v253_v63 }
 0x3e9   :  { %v299_v12 = vpack.c.bf16 %v255_v7, %v255_v7 }
 0x412   :  { %v304_v60 = vpop.permute.xlu0 %303 }
 0x413   :  { %v309_v61 = vsel %vm226_vm2, %v304_v60, 0 }
 0x414   :  { %1908 = vmatpush3.bf16.xpose.msra.mxu1 %v309_v61 }
 0x415   :  { %1919 = vmatprep.subr.bf16.mxu1 %v2386_v0 }
 0x416   :  { %v576_v1 = vpop.permute.xlu0 %575  ;;  %v353_v2 = vpop.permute.xlu1 %352 }
 0x417   :  { %v358_v3 = vsel %vm226_vm2, %v353_v2, 0  ;;  %v582_v4 = vsel %vm226_vm2, %v576_v1, 0.0 }
 0x418   :  { %583 = vadd.xlane.f32.xlu0 %v582_v4  ;;  %1914 = vmatpush3.bf16.xpose.msra.mxu0 %v358_v3 }
 0x419   :  { %1925 = vmatprep.subr.bf16.mxu0 %v2386_v0 }
 0x41a   :  { %v574_v8 = vpop.permute.xlu1 %573  ;;  %v534_v11 = vpop.permute.xlu0 %533 }
 0x41b   :  { %1910 = vmatmul.mubr.msk.bf16.vlgmr.msra.gmra.mrb[0].mxu1 %vm226_vm2, %v298_v5  ;;  %v579_v9 = vsel %vm226_vm2, %v574_v8, 0.0  ;;  %v540_v14 = vsel %vm226_vm2, %v534_v11, 0.0 }
 0x41c   :  { %580 = vadd.xlane.f32.xlu1 %v579_v9  ;;  %1921 = vmatprep.mubr.msk.bf16.mxu1 %vm2387_vm0, %v2386_v0 }
 0x41e   :  { %v532_v13 = vpop.permute.xlu1 %531 }
 0x41f   :  { %1916 = vmatmul.mubr.msk.bf16.vlgmr.msra.gmra.mrb[4].mxu0 %vm226_vm2, %v299_v12  ;;  %v537_v15 = vsel %vm226_vm2, %v532_v13, 0.0 }
 0x420   :  { %541 = vadd.xlane.f32.xlu1 %v540_v14  ;;  %538 = vadd.xlane.f32.xlu0 %v537_v15 }
 0x421   :  { %1927 = vmatprep.mubr.msk.bf16.mxu0 %vm2387_vm0, %v2386_v0 }
 0x4a5   :  { %v584_v16 = vpop.xlane.xlu0 %583 }
 0x4a6   :  { %v586_v17 = vmul.f32 0.125, %v584_v16 }
 0x4a8   :  { %v2649_v18 = vsub.f32 %v2604_v10, %v586_v17 }
 0x4a9   :  { %v581_v19 = vpop.xlane.xlu1 %580 }
 0x4aa   :  { %v585_v20 = vmul.f32 0.125, %v581_v19  ;;  %v590_v21 = vmul.f32 %v2649_v18, %v2649_v18 }
 0x4ac   :  { %v2654_v22 = vsub.f32 %v2600_v6, %v585_v20  ;;  %595 = vrot.lane.b32.xlu1 %v590_v21, %s2389_s20 }
 0x4ad   :  { %v539_v23 = vpop.xlane.xlu0 %538  ;;  %v542_v24 = vpop.xlane.xlu1 %541 }
 0x4ae   :  { %v543_v25 = vmul.f32 0.125, %v539_v23  ;;  %v544_v26 = vmul.f32 0.125, %v542_v24  ;;  %v589_v27 = vmul.f32 %v2654_v22, %v2654_v22 }
 0x4b0   :  { %v2660_v28 = vsub.f32 %v2600_v6, %v543_v25  ;;  %v2663_v29 = vsub.f32 %v2604_v10, %v544_v26  ;;  %593 = vrot.lane.b32.xlu0 %v589_v27, %s2389_s20 }
 0x4b2   :  { %v547_v30 = vmul.f32 %v2660_v28, %v2660_v28  ;;  %v548_v31 = vmul.f32 %v2663_v29, %v2663_v29 }
 0x4b4   :  { %551 = vrot.lane.b32.xlu1 %v547_v30, %s2390_s28  ;;  %553 = vrot.lane.b32.xlu0 %v548_v31, %s2390_s28 }
 0x4ee   :  { %v345_v36 = vpop.f32.mrb[0].mxu1 }
 0x4ef   :  { %v402_v37 = vsel %vm2672_vm3, %v345_v36, -1e+30  ;;  %v1911_v38 = vpop.f32.mrb[1].mxu1 }
 0x4f0   :  { %v348_v39 = vpop.f32.mrb[2].mxu1  ;;  %v404_v40 = vsel %vm226_vm2, %v402_v37, -inf }
 0x4f1   :  { %v1912_v41 = vpop.f32.mrb[3].mxu1  ;;  %405 = vmax.xlane.f32.xlu1 %v404_v40 }
 0x4f2   :  { %v394_v42 = vpop.f32.mrb[4].mxu0 }
 0x4f3   :  { %v403_v43 = vsel %vm2672_vm3, %v394_v42, -1e+30  ;;  %v1917_v44 = vpop.f32.mrb[5].mxu0 }
 0x4f4   :  { %v397_v45 = vpop.f32.mrb[6].mxu0  ;;  %v407_v46 = vsel %vm226_vm2, %v403_v43, -inf }
 0x4f5   :  { %408 = vmax.xlane.f32.xlu0 %v407_v46  ;;  %v1918_v47 = vpop.f32.mrb[7].mxu0 }
 0x51e   :  { %v596_v48 = vpop.permute.xlu1 %595 }
 0x51f   :  { %v602_v49 = vsel %vm226_vm2, %v596_v48, 0.0 }
 0x520   :  { %603 = vadd.xlane.f32.xlu1 %v602_v49 }
 0x522   :  { %v594_v50 = vpop.permute.xlu0 %593 }
 0x523   :  { %v599_v51 = vsel %vm226_vm2, %v594_v50, 0.0 }
 0x524   :  { %600 = vadd.xlane.f32.xlu0 %v599_v51 }
 0x526   :  { %v554_v52 = vpop.permute.xlu0 %553  ;;  %v552_v53 = vpop.permute.xlu1 %551 }
 0x527   :  { %v560_v54 = vsel %vm226_vm2, %v554_v52, 0.0  ;;  %v557_v55 = vsel %vm226_vm2, %v552_v53, 0.0 }
 0x528   :  { %561 = vadd.xlane.f32.xlu1 %v560_v54  ;;  %558 = vadd.xlane.f32.xlu0 %v557_v55 }
 0x539   :  { %481 = vrot.lane.b32.xlu1 %v2688_v56, %s2377_s21 }
 0x53e   :  { %431 = vrot.lane.b32.xlu0 %v2694_v57, %s2377_s21 }
 0x57e   :  { %v406_v58 = vpop.xlane.xlu1 %405 }
 0x57f   :  { %v410_v59 = vsub.f32 %v402_v37, %v406_v58 }
 0x581   :  { %v412_v60 = vmul.f32 1.442695, %v410_v59 }
 0x582   :  { %v409_v61 = vpop.xlane.xlu0 %408 }
 0x583   :  { %2078 = vpow2.f32 %v412_v60  ;;  %v411_v62 = vsub.f32 %v403_v43, %v409_v61 }
 0x585   :  { %v414_v63 = vmul.f32 1.442695, %v411_v62 }
 0x587   :  { %2080 = vpow2.f32 %v414_v63 }
 0x58d   :  { %v2079_v1 = vpop.eup %2078 }
 0x58e   :  { %v416_v2 = vsel %vm226_vm2, %v2079_v1, 0.0 }
 0x58f   :  { %417 = vadd.xlane.f32.xlu0 %v416_v2 }
 0x591   :  { %v2081_v3 = vpop.eup %2080 }
 0x592   :  { %v419_v4 = vsel %vm226_vm2, %v2081_v3, 0.0 }
 0x593   :  { %420 = vadd.xlane.f32.xlu1 %v419_v4 }
 0x5ad   :  { %v604_v5 = vpop.xlane.xlu1 %603 }
 0x5ae   :  { %v606_v7 = vmul.f32 0.125, %v604_v5 }
 0x5b0   :  { %v608_v8 = vadd.f32 1e-05, %v606_v7 }
 0x5b1   :  { %v601_v9 = vpop.xlane.xlu0 %600 }
 0x5b2   :  { %2082 = vrsqrt.f32 %v608_v8  ;;  %v605_v11 = vmul.f32 0.125, %v601_v9 }
 0x5b4   :  { %v607_v12 = vadd.f32 1e-05, %v605_v11 }
 0x5b5   :  { %v562_v13 = vpop.xlane.xlu1 %561  ;;  %v559_v14 = vpop.xlane.xlu0 %558 }
 0x5b6   :  { %2084 = vrsqrt.f32 %v607_v12  ;;  %v564_v15 = vmul.f32 0.125, %v562_v13  ;;  %v563_v16 = vmul.f32 0.125, %v559_v14 }
 0x5b8   :  { %v566_v17 = vadd.f32 1e-05, %v564_v15  ;;  %v565_v19 = vadd.f32 1e-05, %v563_v16 }
 0x5b9   :  { %v482_v20 = vpop.permute.xlu1 %481  ;;  %v432_v21 = vpop.permute.xlu0 %431 }
 0x5ba   :  { %2086 = vrsqrt.f32 %v566_v17  ;;  %v487_v23 = vsel %vm436_vm4, %v482_v20, 0  ;;  %v438_v24 = vsel %vm436_vm4, %v432_v21, 0 }
 0x5bb   :  { %2088 = vrsqrt.f32 %v565_v19  ;;  %1920 = vmatpush3.bf16.msra.mxu1 %v438_v24  ;;  %1926 = vmatpush3.bf16.msra.mxu0 %v487_v23 }
 0x5bc   :  { %v2083_v25 = vpop.eup %2082  ;;  %1937 = vmatprep.subr.bf16.mxu0 %v2386_v0  ;;  %1931 = vmatprep.subr.bf16.mxu1 %v2386_v0 }
 0x5bd   :  { %v612_v26 = vmul.f32 %v2083_v25, %v2649_v18 }
 0x5bf   :  { %v616_v27 = vpack.c.bf16 %v612_v26, %v612_v26 }
 0x5c0   :  { %v2085_v30 = vpop.eup %2084 }
 0x5c1   :  { %673 = vrot.lane.b32.xlu0 %v616_v27, %s2389_s20  ;;  %v611_v31 = vmul.f32 %v2085_v30, %v2654_v22 }
 0x5c3   :  { %v615_v32 = vpack.c.bf16 %v611_v31, %v611_v31 }
 0x5c4   :  { %v2087_v33 = vpop.eup %2086 }
 0x5c5   :  { %v2089_v34 = vpop.eup %2088  ;;  %621 = vrot.lane.b32.xlu1 %v615_v32, %s2389_s20  ;;  %v570_v36 = vmul.f32 %v2087_v33, %v2663_v29 }
 0x5c6   :  { %v569_v37 = vmul.f32 %v2089_v34, %v2660_v28 }
 0x5c7   :  { %v572_v38 = vmul.f32 0.35355338, %v570_v36 }
 0x5c8   :  { %v571_v39 = vmul.f32 0.35355338, %v569_v37 }
 0x5c9   :  { %v614_v40 = vpack.c.bf16 %v572_v38, %v572_v38 }
 0x5ca   :  { %v613_v41 = vpack.c.bf16 %v571_v39, %v571_v39 }
 0x5cb   :  { %670 = vrot.lane.b32.xlu0 %v614_v40, %s2390_s28 }
 0x5cc   :  { %618 = vrot.lane.b32.xlu1 %v613_v41, %s2390_s28 }
 0x5cf   :  { %889 = vrot.lane.b32.xlu0 %v2604_v10, %s2391_s29 }
 0x5d0   :  { %887 = vrot.lane.b32.xlu1 %v2600_v6, %s2391_s29 }
 0x5d3   :  { %847 = vrot.lane.b32.xlu0 %v2604_v10, %s2392_s30 }
 0x5d4   :  { %845 = vrot.lane.b32.xlu1 %v2600_v6, %s2392_s30 }
 0x61c   :  { %v418_v18 = vpop.xlane.xlu0 %417 }
 0x61d   :  { %2090 = vrcp.f32 %v418_v18 }
 0x620   :  { %v421_v22 = vpop.xlane.xlu1 %420 }
 0x621   :  { %2092 = vrcp.f32 %v421_v22 }
 0x627   :  { %v2091_v28 = vpop.eup %2090 }
 0x628   :  { %v424_v29 = vmul.f32 %v2091_v28, %v2079_v1 }
 0x62a   :  { %v426_v42 = vpack.c.bf16 %v424_v29, %v424_v29 }
 0x62b   :  { %v2093_v43 = vpop.eup %2092 }
 0x62c   :  { %v425_v44 = vmul.f32 %v2093_v43, %v2081_v3  ;;  %1922 = vmatmul.mubr.msk.bf16.vlgmr.msra.gmra.mrb[4].mxu1 %vm226_vm2, %v426_v42 }
 0x62d   :  { %1933 = vmatprep.mubr.msk.bf16.mxu1 %vm2387_vm0, %v2386_v0 }
 0x62e   :  { %v427_v45 = vpack.c.bf16 %v425_v44, %v425_v44 }
 0x630   :  { %1928 = vmatmul.mubr.msk.bf16.vlgmr.msra.gmra.mrb[8].mxu0 %vm226_vm2, %v427_v45 }
 0x631   :  { %1939 = vmatprep.mubr.msk.bf16.mxu0 %vm2387_vm0, %v2386_v0 }
 0x633   :  { %v674_v46 = vpop.permute.xlu0 %673 }
 0x634   :  { %v679_v47 = vsel %vm226_vm2, %v674_v46, 0 }
 0x635   :  { %1938 = vmatpush3.bf16.xpose.msra.mxu0 %v679_v47 }
 0x636   :  { %1949 = vmatprep.subr.bf16.mxu0 %v2386_v0 }
 0x637   :  { %v622_v48 = vpop.permute.xlu1 %621 }
 0x638   :  { %v627_v49 = vsel %vm226_vm2, %v622_v48, 0 }
 0x639   :  { %1932 = vmatpush3.bf16.xpose.msra.mxu1 %v627_v49 }
 0x63a   :  { %1943 = vmatprep.subr.bf16.mxu1 %v2386_v0 }
 0x63d   :  { %v671_v50 = vpop.permute.xlu0 %670 }
 0x63e   :  { %v619_v51 = vpop.permute.xlu1 %618  ;;  %1940 = vmatmul.mubr.msk.bf16.vlgmr.msra.gmra.mrb[12].mxu0 %vm226_vm2, %v671_v50 }
 0x63f   :  { %1951 = vmatprep.mubr.msk.bf16.mxu0 %vm2387_vm0, %v2386_v0 }
 0x640   :  { %1934 = vmatmul.mubr.msk.bf16.vlgmr.msra.gmra.mrb[8].mxu1 %vm226_vm2, %v619_v51 }
 0x641   :  { %v890_v52 = vpop.permute.xlu0 %889  ;;  %1945 = vmatprep.mubr.msk.bf16.mxu1 %vm2387_vm0, %v2386_v0 }
 0x642   :  { %v888_v53 = vpop.permute.xlu1 %887  ;;  %v896_v54 = vsel %vm226_vm2, %v890_v52, 0.0 }
 0x643   :  { %v893_v55 = vsel %vm226_vm2, %v888_v53, 0.0  ;;  %897 = vadd.xlane.f32.xlu0 %v896_v54 }
 0x644   :  { %894 = vadd.xlane.f32.xlu1 %v893_v55 }
 0x645   :  { %v848_v58 = vpop.permute.xlu0 %847 }
 0x646   :  { %v846_v59 = vpop.permute.xlu1 %845  ;;  %v854_v60 = vsel %vm226_vm2, %v848_v58, 0.0 }
 0x647   :  { %v851_v61 = vsel %vm226_vm2, %v846_v59, 0.0 }
 0x648   :  { %852 = vadd.xlane.f32.xlu0 %v851_v61  ;;  %855 = vadd.xlane.f32.xlu1 %v854_v60 }
 0x6d0   :  { %v898_v62 = vpop.xlane.xlu0 %897 }
 0x6d1   :  { %v895_v63 = vpop.xlane.xlu1 %894  ;;  %v900_v1 = vmul.f32 0.125, %v898_v62 }
 0x6d2   :  { %v899_v2 = vmul.f32 0.125, %v895_v63 }
 0x6d3   :  { %v2741_v3 = vsub.f32 %v2604_v10, %v900_v1 }
 0x6d4   :  { %v2744_v4 = vsub.f32 %v2600_v6, %v899_v2 }
 0x6d5   :  { %v856_v5 = vpop.xlane.xlu1 %855  ;;  %v853_v7 = vpop.xlane.xlu0 %852  ;;  %v904_v8 = vmul.f32 %v2741_v3, %v2741_v3 }
 0x6d6   :  { %v858_v9 = vmul.f32 0.125, %v856_v5  ;;  %v857_v11 = vmul.f32 0.125, %v853_v7  ;;  %v903_v12 = vmul.f32 %v2744_v4, %v2744_v4 }
 0x6d7   :  { %909 = vrot.lane.b32.xlu1 %v904_v8, %s2391_s29 }
 0x6d8   :  { %v2752_v13 = vsub.f32 %v2604_v10, %v858_v9  ;;  %v2755_v14 = vsub.f32 %v2600_v6, %v857_v11  ;;  %907 = vrot.lane.b32.xlu0 %v903_v12, %s2391_s29 }
 0x6da   :  { %v862_v15 = vmul.f32 %v2752_v13, %v2752_v13  ;;  %v861_v16 = vmul.f32 %v2755_v14, %v2755_v14 }
 0x6dc   :  { %867 = vrot.lane.b32.xlu0 %v862_v15, %s2392_s30  ;;  %865 = vrot.lane.b32.xlu1 %v861_v16, %s2392_s30 }
 0x6ff   :  { %v2764_v17 = vpop.f32.mrb[4].mxu1 }
 0x700   :  { %v1923_v19 = vpop.f32.mrb[5].mxu1 }
 0x701   :  { %v477_v20 = vpop.f32.mrb[6].mxu1 }
 0x702   :  { %v1924_v21 = vpop.f32.mrb[7].mxu1 }
 0x703   :  { %v2766_v23 = vpop.f32.mrb[8].mxu0 }
 0x704   :  { %v1929_v24 = vpop.f32.mrb[9].mxu0 }
 0x705   :  { %v526_v25 = vpop.f32.mrb[10].mxu0 }
 0x706   :  { %v1930_v26 = vpop.f32.mrb[11].mxu0 }
 0x711   :  { %v715_v27 = vpop.f32.mrb[12].mxu0 }
 0x712   :  { %v722_v30 = vsel %vm2672_vm3, %v715_v27, -1e+30  ;;  %v1941_v31 = vpop.f32.mrb[13].mxu0 }
 0x713   :  { %v663_v32 = vpop.f32.mrb[8].mxu1  ;;  %v718_v33 = vpop.f32.mrb[14].mxu0  ;;  %v726_v34 = vsel %vm226_vm2, %v722_v30, -inf }
 0x714   :  { %v721_v36 = vsel %vm2672_vm3, %v663_v32, -1e+30  ;;  %v1935_v37 = vpop.f32.mrb[9].mxu1  ;;  %727 = vmax.xlane.f32.xlu0 %v726_v34  ;;  %v1942_v38 = vpop.f32.mrb[15].mxu0 }
 0x715   :  { %v666_v39 = vpop.f32.mrb[10].mxu1  ;;  %v723_v40 = vsel %vm226_vm2, %v721_v36, -inf }
 0x716   :  { %v1936_v41 = vpop.f32.mrb[11].mxu1  ;;  %724 = vmax.xlane.f32.xlu1 %v723_v40 }
 0x749   :  { %v910_v18 = vpop.permute.xlu1 %909 }
 0x74a   :  { %v908_v22 = vpop.permute.xlu0 %907  ;;  %v916_v28 = vsel %vm226_vm2, %v910_v18, 0.0 }
 0x74b   :  { %917 = vadd.xlane.f32.xlu1 %v916_v28  ;;  %v913_v29 = vsel %vm226_vm2, %v908_v22, 0.0 }
 0x74c   :  { %914 = vadd.xlane.f32.xlu0 %v913_v29 }
 0x74e   :  { %v866_v42 = vpop.permute.xlu1 %865  ;;  %v868_v43 = vpop.permute.xlu0 %867 }
 0x74f   :  { %v874_v44 = vsel %vm226_vm2, %v868_v43, 0.0  ;;  %v871_v45 = vsel %vm226_vm2, %v866_v42, 0.0 }
 0x750   :  { %875 = vadd.xlane.f32.xlu1 %v874_v44  ;;  %872 = vadd.xlane.f32.xlu0 %v871_v45 }
 0x761   :  { %795 = vrot.lane.b32.xlu1 %v2688_v56, %s2393_s11 }
 0x766   :  { %747 = vrot.lane.b32.xlu0 %v2694_v57, %s2393_s11 }
 0x7a1   :  { %v728_v46 = vpop.xlane.xlu0 %727 }
 0x7a2   :  { %v730_v47 = vsub.f32 %v722_v30, %v728_v46 }
 0x7a3   :  { %v725_v48 = vpop.xlane.xlu1 %724 }
 0x7a4   :  { %v733_v49 = vmul.f32 1.442695, %v730_v47  ;;  %v729_v50 = vsub.f32 %v721_v36, %v725_v48 }
 0x7a6   :  { %2094 = vpow2.f32 %v733_v49  ;;  %v731_v51 = vmul.f32 1.442695, %v729_v50 }
 0x7a8   :  { %2096 = vpow2.f32 %v731_v51 }
 0x7b0   :  { %v2095_v52 = vpop.eup %2094 }
 0x7b1   :  { %v738_v53 = vsel %vm226_vm2, %v2095_v52, 0.0 }
 0x7b2   :  { %v2097_v54 = vpop.eup %2096  ;;  %739 = vadd.xlane.f32.xlu1 %v738_v53 }
 0x7b3   :  { %v735_v55 = vsel %vm226_vm2, %v2097_v54, 0.0 }
 0x7b4   :  { %736 = vadd.xlane.f32.xlu0 %v735_v55 }
 0x7d8   :  { %v918_v58 = vpop.xlane.xlu1 %917 }
 0x7d9   :  { %v920_v59 = vmul.f32 0.125, %v918_v58  ;;  %v915_v60 = vpop.xlane.xlu0 %914 }
 0x7da   :  { %v919_v61 = vmul.f32 0.125, %v915_v60 }
 0x7db   :  { %v922_v62 = vadd.f32 1e-05, %v920_v59 }
 0x7dc   :  { %v921_v63 = vadd.f32 1e-05, %v919_v61 }
 0x7dd   :  { %2098 = vrsqrt.f32 %v922_v62  ;;  %v876_v1 = vpop.xlane.xlu1 %875  ;;  %v873_v2 = vpop.xlane.xlu0 %872 }
 0x7de   :  { %2100 = vrsqrt.f32 %v921_v63  ;;  %v878_v5 = vmul.f32 0.125, %v876_v1  ;;  %v877_v7 = vmul.f32 0.125, %v873_v2 }
 0x7e0   :  { %v880_v8 = vadd.f32 1e-05, %v878_v5  ;;  %v879_v9 = vadd.f32 1e-05, %v877_v7 }
 0x7e1   :  { %v796_v11 = vpop.permute.xlu1 %795  ;;  %v748_v12 = vpop.permute.xlu0 %747 }
 0x7e2   :  { %2102 = vrsqrt.f32 %v880_v8  ;;  %v801_v15 = vsel %vm436_vm4, %v796_v11, 0  ;;  %v753_v16 = vsel %vm436_vm4, %v748_v12, 0 }
 0x7e3   :  { %2104 = vrsqrt.f32 %v879_v9  ;;  %1944 = vmatpush3.bf16.msra.mxu1 %v753_v16  ;;  %1950 = vmatpush3.bf16.msra.mxu0 %v801_v15 }
 0x7e4   :  { %1955 = vmatprep.subr.bf16.mxu1 %v2386_v0  ;;  %1961 = vmatprep.subr.bf16.mxu0 %v2386_v0 }
 0x7e7   :  { %v2099_v19 = vpop.eup %2098 }
 0x7e8   :  { %v2101_v20 = vpop.eup %2100  ;;  %v926_v21 = vmul.f32 %v2099_v19, %v2741_v3 }
 0x7e9   :  { %v925_v24 = vmul.f32 %v2101_v20, %v2744_v4 }
 0x7ea   :  { %v930_v25 = vpack.c.bf16 %v926_v21, %v926_v21 }
 0x7eb   :  { %v929_v26 = vpack.c.bf16 %v925_v24, %v925_v24 }
 0x7ec   :  { %v2103_v27 = vpop.eup %2102  ;;  %987 = vrot.lane.b32.xlu0 %v930_v25, %s2391_s29 }
 0x7ed   :  { %v2105_v30 = vpop.eup %2104  ;;  %935 = vrot.lane.b32.xlu1 %v929_v26, %s2391_s29  ;;  %v884_v31 = vmul.f32 %v2103_v27, %v2752_v13 }
 0x7ee   :  { %v883_v32 = vmul.f32 %v2105_v30, %v2755_v14 }
 0x7ef   :  { %v886_v33 = vmul.f32 0.35355338, %v884_v31 }
 0x7f0   :  { %v885_v34 = vmul.f32 0.35355338, %v883_v32 }
 0x7f1   :  { %v928_v36 = vpack.c.bf16 %v886_v33, %v886_v33 }
 0x7f2   :  { %v927_v37 = vpack.c.bf16 %v885_v34, %v885_v34 }
 0x7f3   :  { %984 = vrot.lane.b32.xlu0 %v928_v36, %s2392_s30 }
 0x7f4   :  { %932 = vrot.lane.b32.xlu1 %v927_v37, %s2392_s30 }
 0x7f7   :  { %1203 = vrot.lane.b32.xlu0 %v2604_v10, %s2394_s13 }
 0x7f8   :  { %1201 = vrot.lane.b32.xlu1 %v2600_v6, %s2394_s13 }
 0x7fb   :  { %1161 = vrot.lane.b32.xlu0 %v2604_v10, %s2395_s1 }
 0x7fc   :  { %1159 = vrot.lane.b32.xlu1 %v2600_v6, %s2395_s1 }
 0x83f   :  { %v740_v3 = vpop.xlane.xlu1 %739 }
 0x840   :  { %2106 = vrcp.f32 %v740_v3 }
 0x841   :  { %v737_v4 = vpop.xlane.xlu0 %736 }
 0x842   :  { %2108 = vrcp.f32 %v737_v4 }
 0x84a   :  { %v2107_v13 = vpop.eup %2106 }
 0x84b   :  { %v744_v14 = vmul.f32 %v2107_v13, %v2095_v52 }
 0x84c   :  { %v2109_v38 = vpop.eup %2108 }
 0x84d   :  { %v743_v39 = vmul.f32 %v2109_v38, %v2097_v54  ;;  %v746_v40 = vpack.c.bf16 %v744_v14, %v744_v14 }
 0x84f   :  { %1952 = vmatmul.mubr.msk.bf16.vlgmr.msra.gmra.mrb[16].mxu0 %vm226_vm2, %v746_v40  ;;  %v745_v41 = vpack.c.bf16 %v743_v39, %v743_v39 }
 0x850   :  { %1963 = vmatprep.mubr.msk.bf16.mxu0 %vm2387_vm0, %v2386_v0 }
 0x851   :  { %1946 = vmatmul.mubr.msk.bf16.vlgmr.msra.gmra.mrb[12].mxu1 %vm226_vm2, %v745_v41 }
 0x852   :  { %1957 = vmatprep.mubr.msk.bf16.mxu1 %vm2387_vm0, %v2386_v0 }
 0x85e   :  { %v988_v18 = vpop.permute.xlu0 %987 }
 0x85f   :  { %v936_v22 = vpop.permute.xlu1 %935  ;;  %v993_v28 = vsel %vm226_vm2, %v988_v18, 0 }
 0x860   :  { %v941_v29 = vsel %vm226_vm2, %v936_v22, 0  ;;  %1962 = vmatpush3.bf16.xpose.msra.mxu0 %v993_v28 }
 0x861   :  { %1956 = vmatpush3.bf16.xpose.msra.mxu1 %v941_v29  ;;  %1973 = vmatprep.subr.bf16.mxu0 %v2386_v0 }
 0x862   :  { %1967 = vmatprep.subr.bf16.mxu1 %v2386_v0 }
 0x865   :  { %v985_v42 = vpop.permute.xlu0 %984 }
 0x866   :  { %v933_v43 = vpop.permute.xlu1 %932 }
 0x867   :  { %1964 = vmatmul.mubr.msk.bf16.vlgmr.msra.gmra.mrb[20].mxu0 %vm226_vm2, %v985_v42 }
 0x868   :  { %1958 = vmatmul.mubr.msk.bf16.vlgmr.msra.gmra.mrb[16].mxu1 %vm226_vm2, %v933_v43  ;;  %1975 = vmatprep.mubr.msk.bf16.mxu0 %vm2387_vm0, %v2386_v0 }
 0x869   :  { %v1204_v44 = vpop.permute.xlu0 %1203  ;;  %1969 = vmatprep.mubr.msk.bf16.mxu1 %vm2387_vm0, %v2386_v0 }
 0x86a   :  { %v1202_v45 = vpop.permute.xlu1 %1201  ;;  %v1210_v46 = vsel %vm226_vm2, %v1204_v44, 0.0 }
 0x86b   :  { %v1207_v47 = vsel %vm226_vm2, %v1202_v45, 0.0  ;;  %1211 = vadd.xlane.f32.xlu0 %v1210_v46 }
 0x86c   :  { %1208 = vadd.xlane.f32.xlu1 %v1207_v47 }
 0x86d   :  { %v1162_v48 = vpop.permute.xlu0 %1161 }
 0x86e   :  { %v1160_v49 = vpop.permute.xlu1 %1159  ;;  %v1168_v50 = vsel %vm226_vm2, %v1162_v48, 0.0 }
 0x86f   :  { %v1165_v51 = vsel %vm226_vm2, %v1160_v49, 0.0 }
 0x870   :  { %1166 = vadd.xlane.f32.xlu0 %v1165_v51  ;;  %1169 = vadd.xlane.f32.xlu1 %v1168_v50 }
 0x8f8   :  { %v1212_v52 = vpop.xlane.xlu0 %1211 }
 0x8f9   :  { %v1209_v53 = vpop.xlane.xlu1 %1208  ;;  %v1214_v54 = vmul.f32 0.125, %v1212_v52 }
 0x8fa   :  { %v1213_v55 = vmul.f32 0.125, %v1209_v53 }
 0x8fb   :  { %v2823_v58 = vsub.f32 %v2604_v10, %v1214_v54 }
 0x8fc   :  { %v2826_v59 = vsub.f32 %v2600_v6, %v1213_v55 }
 0x8fd   :  { %v1170_v60 = vpop.xlane.xlu1 %1169  ;;  %v1167_v61 = vpop.xlane.xlu0 %1166  ;;  %v1218_v62 = vmul.f32 %v2823_v58, %v2823_v58 }
 0x8fe   :  { %v1172_v63 = vmul.f32 0.125, %v1170_v60  ;;  %v1171_v1 = vmul.f32 0.125, %v1167_v61  ;;  %v1217_v2 = vmul.f32 %v2826_v59, %v2826_v59 }
 0x8ff   :  { %1223 = vrot.lane.b32.xlu1 %v1218_v62, %s2394_s13 }
 0x900   :  { %v2834_v5 = vsub.f32 %v2604_v10, %v1172_v63  ;;  %v2837_v7 = vsub.f32 %v2600_v6, %v1171_v1  ;;  %1221 = vrot.lane.b32.xlu0 %v1217_v2, %s2394_s13 }
 0x902   :  { %v1176_v8 = vmul.f32 %v2834_v5, %v2834_v5  ;;  %v1175_v9 = vmul.f32 %v2837_v7, %v2837_v7 }
 0x904   :  { %1181 = vrot.lane.b32.xlu0 %v1176_v8, %s2395_s1  ;;  %1179 = vrot.lane.b32.xlu1 %v1175_v9, %s2395_s1 }
 0x922   :  { %v2846_v11 = vpop.f32.mrb[16].mxu0 }
 0x923   :  { %v1953_v12 = vpop.f32.mrb[17].mxu0 }
 0x924   :  { %v2848_v10 = vpop.f32.mrb[12].mxu1  ;;  %v840_v15 = vpop.f32.mrb[18].mxu0 }
 0x925   :  { %v1947_v6 = vpop.f32.mrb[13].mxu1  ;;  %v1954_v16 = vpop.f32.mrb[19].mxu0 }
 0x926   :  { %v792_v19 = vpop.f32.mrb[14].mxu1 }
 0x927   :  { %v1948_v20 = vpop.f32.mrb[15].mxu1 }
 0x93a   :  { %v1029_v21 = vpop.f32.mrb[20].mxu0 }
 0x93b   :  { %v977_v24 = vpop.f32.mrb[16].mxu1  ;;  %v1036_v25 = vsel %vm2672_vm3, %v1029_v21, -1e+30  ;;  %v1965_v26 = vpop.f32.mrb[21].mxu0 }
 0x93c   :  { %v1035_v27 = vsel %vm2672_vm3, %v977_v24, -1e+30  ;;  %v1959_v30 = vpop.f32.mrb[17].mxu1  ;;  %v1032_v31 = vpop.f32.mrb[22].mxu0  ;;  %v1040_v32 = vsel %vm226_vm2, %v1036_v25, -inf }
 0x93d   :  { %v980_v33 = vpop.f32.mrb[18].mxu1  ;;  %v1037_v34 = vsel %vm226_vm2, %v1035_v27, -inf  ;;  %1041 = vmax.xlane.f32.xlu0 %v1040_v32  ;;  %v1966_v36 = vpop.f32.mrb[23].mxu0 }
 0x93e   :  { %v1960_v37 = vpop.f32.mrb[19].mxu1  ;;  %1038 = vmax.xlane.f32.xlu1 %v1037_v34 }
 0x971   :  { %v1224_v3 = vpop.permute.xlu1 %1223 }
 0x972   :  { %v1222_v4 = vpop.permute.xlu0 %1221  ;;  %v1230_v13 = vsel %vm226_vm2, %v1224_v3, 0.0 }
 0x973   :  { %1231 = vadd.xlane.f32.xlu1 %v1230_v13  ;;  %v1227_v14 = vsel %vm226_vm2, %v1222_v4, 0.0 }
 0x974   :  { %1228 = vadd.xlane.f32.xlu0 %v1227_v14 }
 0x976   :  { %v1180_v38 = vpop.permute.xlu1 %1179  ;;  %v1182_v39 = vpop.permute.xlu0 %1181 }
 0x977   :  { %v1188_v40 = vsel %vm226_vm2, %v1182_v39, 0.0  ;;  %v1185_v41 = vsel %vm226_vm2, %v1180_v38, 0.0 }
 0x978   :  { %1189 = vadd.xlane.f32.xlu1 %v1188_v40  ;;  %1186 = vadd.xlane.f32.xlu0 %v1185_v41 }
 0x989   :  { %1109 = vrot.lane.b32.xlu1 %v2688_v56, %s2396_s10 }
 0x98e   :  { %1061 = vrot.lane.b32.xlu0 %v2694_v57, %s2396_s10 }
 0x9ca   :  { %v1042_v18 = vpop.xlane.xlu0 %1041 }
 0x9cb   :  { %v1039_v22 = vpop.xlane.xlu1 %1038  ;;  %v1044_v28 = vsub.f32 %v1036_v25, %v1042_v18 }
 0x9cc   :  { %v1043_v29 = vsub.f32 %v1035_v27, %v1039_v22 }
 0x9cd   :  { %v1047_v42 = vmul.f32 1.442695, %v1044_v28 }
 0x9ce   :  { %v1045_v43 = vmul.f32 1.442695, %v1043_v29 }
 0x9cf   :  { %2110 = vpow2.f32 %v1047_v42 }
 0x9d0   :  { %2112 = vpow2.f32 %v1045_v43 }
 0x9d9   :  { %v2111_v44 = vpop.eup %2110 }
 0x9da   :  { %v2113_v45 = vpop.eup %2112  ;;  %v1052_v46 = vsel %vm226_vm2, %v2111_v44, 0.0 }
 0x9db   :  { %v1049_v47 = vsel %vm226_vm2, %v2113_v45, 0.0  ;;  %1053 = vadd.xlane.f32.xlu1 %v1052_v46 }
 0x9dc   :  { %1050 = vadd.xlane.f32.xlu0 %v1049_v47 }
 0xa00   :  { %v1232_v48 = vpop.xlane.xlu1 %1231 }
 0xa01   :  { %v1234_v49 = vmul.f32 0.125, %v1232_v48  ;;  %v1229_v50 = vpop.xlane.xlu0 %1228 }
 0xa02   :  { %v1233_v51 = vmul.f32 0.125, %v1229_v50 }
 0xa03   :  { %v1236_v52 = vadd.f32 1e-05, %v1234_v49 }
 0xa04   :  { %v1235_v53 = vadd.f32 1e-05, %v1233_v51 }
 0xa05   :  { %2114 = vrsqrt.f32 %v1236_v52  ;;  %v1190_v54 = vpop.xlane.xlu1 %1189  ;;  %v1187_v55 = vpop.xlane.xlu0 %1186 }
 0xa06   :  { %2116 = vrsqrt.f32 %v1235_v53  ;;  %v1192_v60 = vmul.f32 0.125, %v1190_v54  ;;  %v1191_v61 = vmul.f32 0.125, %v1187_v55 }
 0xa08   :  { %v1194_v62 = vadd.f32 1e-05, %v1192_v60  ;;  %v1193_v63 = vadd.f32 1e-05, %v1191_v61 }
 0xa09   :  { %v1110_v1 = vpop.permute.xlu1 %1109  ;;  %v1062_v2 = vpop.permute.xlu0 %1061 }
 0xa0a   :  { %2118 = vrsqrt.f32 %v1194_v62  ;;  %v1115_v8 = vsel %vm436_vm4, %v1110_v1, 0  ;;  %v1067_v9 = vsel %vm436_vm4, %v1062_v2, 0 }
 0xa0b   :  { %2120 = vrsqrt.f32 %v1193_v63  ;;  %1968 = vmatpush3.bf16.msra.mxu1 %v1067_v9  ;;  %1974 = vmatpush3.bf16.msra.mxu0 %v1115_v8 }
 0xa0c   :  { %1979 = vmatprep.subr.bf16.mxu1 %v2386_v0  ;;  %1985 = vmatprep.subr.bf16.mxu0 %v2386_v0 }
 0xa0f   :  { %v2115_v12 = vpop.eup %2114 }
 0xa10   :  { %v2117_v15 = vpop.eup %2116  ;;  %v1240_v6 = vmul.f32 %v2115_v12, %v2823_v58 }
 0xa11   :  { %v1239_v16 = vmul.f32 %v2117_v15, %v2826_v59  ;;  %v843_v15 = vpack.c.bf16 %v2848_v10, %v2848_v10 }
 0xa12   :  { %v1244_v19 = vpack.c.bf16 %v1240_v6, %v1240_v6 }
 0xa13   :  { %v1243_v20 = vpack.c.bf16 %v1239_v16, %v1239_v16  ;;  %v844_v16 = vpack.c.bf16 %v2846_v11, %v2846_v11 }
 0xa14   :  { %v2119_v21 = vpop.eup %2118  ;;  %1301 = vrot.lane.b32.xlu0 %v1244_v19, %s2394_s13 }
 0xa15   :  { %v2121_v24 = vpop.eup %2120  ;;  %1249 = vrot.lane.b32.xlu1 %v1243_v20, %s2394_s13  ;;  %v1198_v25 = vmul.f32 %v2119_v21, %v2834_v5 }
 0xa16   :  { %v1197_v26 = vmul.f32 %v2121_v24, %v2837_v7 }
 0xa17   :  { %v1200_v27 = vmul.f32 0.35355338, %v1198_v25 }
 0xa18   :  { %v1199_v30 = vmul.f32 0.35355338, %v1197_v26 }
 0xa19   :  { %v1242_v31 = vpack.c.bf16 %v1200_v27, %v1200_v27 }
 0xa1a   :  { %v1241_v32 = vpack.c.bf16 %v1199_v30, %v1199_v30 }
 0xa1b   :  { %1298 = vrot.lane.b32.xlu0 %v1242_v31, %s2395_s1 }
 0xa1c   :  { %1246 = vrot.lane.b32.xlu1 %v1241_v32, %s2395_s1  ;;  %v2061_v32 = vld [vmem:[#allocation8] sm:$0xff]  }
 0xa68   :  { %v1054_v58 = vpop.xlane.xlu1 %1053 }
 0xa69   :  { %2122 = vrcp.f32 %v1054_v58  ;;  %v1051_v59 = vpop.xlane.xlu0 %1050  ;;  %v2062_v58 = vld [vmem:[#allocation8 + $0x8] sm:$0xff]  }
 0xa6a   :  { %2124 = vrcp.f32 %v1051_v59 }
 0xa73   :  { %v2123_v33 = vpop.eup %2122 }
 0xa74   :  { %v2125_v34 = vpop.eup %2124  ;;  %v1058_v36 = vmul.f32 %v2123_v33, %v2111_v44 }
 0xa75   :  { %v1057_v37 = vmul.f32 %v2125_v34, %v2113_v45 }
 0xa76   :  { %v1060_v3 = vpack.c.bf16 %v1058_v36, %v1058_v36 }
 0xa77   :  { %v1059_v5 = vpack.c.bf16 %v1057_v37, %v1057_v37 }
 0xa78   :  { %1976 = vmatmul.mubr.msk.bf16.vlgmr.msra.gmra.mrb[24].mxu0 %vm226_vm2, %v1060_v3 }
 0xa79   :  { %1970 = vmatmul.mubr.msk.bf16.vlgmr.msra.gmra.mrb[20].mxu1 %vm226_vm2, %v1059_v5  ;;  %1987 = vmatprep.mubr.msk.bf16.mxu0 %vm2387_vm0, %v2386_v0 }
 0xa7a   :  { %1981 = vmatprep.mubr.msk.bf16.mxu1 %vm2387_vm0, %v2386_v0 }
 0xa86   :  { %v1302_v7 = vpop.permute.xlu0 %1301 }
 0xa87   :  { %v1250_v4 = vpop.permute.xlu1 %1249  ;;  %v1307_v13 = vsel %vm226_vm2, %v1302_v7, 0 }
 0xa88   :  { %v1255_v14 = vsel %vm226_vm2, %v1250_v4, 0  ;;  %1986 = vmatpush3.bf16.xpose.msra.mxu0 %v1307_v13 }
 0xa89   :  { %1980 = vmatpush3.bf16.xpose.msra.mxu1 %v1255_v14  ;;  %1997 = vmatprep.subr.bf16.mxu0 %v2386_v0 }
 0xa8a   :  { %1991 = vmatprep.subr.bf16.mxu1 %v2386_v0 }
 0xa8d   :  { %v1299_v38 = vpop.permute.xlu0 %1298 }
 0xa8e   :  { %v1247_v39 = vpop.permute.xlu1 %1246 }
 0xa8f   :  { %1988 = vmatmul.mubr.msk.bf16.vlgmr.msra.gmra.mrb[28].mxu0 %vm226_vm2, %v1299_v38 }
 0xa90   :  { %1982 = vmatmul.mubr.msk.bf16.vlgmr.msra.gmra.mrb[24].mxu1 %vm226_vm2, %v1247_v39  ;;  %1999 = vmatprep.mubr.msk.bf16.mxu0 %vm2387_vm0, %v2386_v0 }
 0xa91   :  { %1993 = vmatprep.mubr.msk.bf16.mxu1 %vm2387_vm0, %v2386_v0 }
 0xb4b   :  { %v1151_v40 = vpop.f32.mrb[24].mxu0 }
 0xb4c   :  { %v1103_v41 = vpop.f32.mrb[20].mxu1  ;;  %v1977_v18 = vpop.f32.mrb[25].mxu0  ;;  %v1158_v19 = vpack.c.bf16 %v1151_v40, %v1151_v40  ;;  %v530_v40 = vpack.c.bf16 %v2766_v23, %v2766_v23  ;;  %v1838_v23 = vld [vmem:[#allocation10] ss:$0 sm:$0xff] }
 0xb4d   :  { %v1971_v22 = vpop.f32.mrb[21].mxu1  ;;  %v1154_v28 = vpop.f32.mrb[26].mxu0  ;;  %v1157_v6 = vpack.c.bf16 %v1103_v41, %v1103_v41  ;;  %v529_v18 = vpack.c.bf16 %v2764_v17, %v2764_v17 }
 0xb4e   :  { %v1106_v29 = vpop.f32.mrb[22].mxu1  ;;  %v1978_v42 = vpop.f32.mrb[27].mxu0 }
 0xb4f   :  { %v1972_v43 = vpop.f32.mrb[23].mxu1 }
 0xb62   :  { %v1343_v44 = vpop.f32.mrb[28].mxu0 }
 0xb63   :  { %v1291_v45 = vpop.f32.mrb[24].mxu1  ;;  %v1350_v46 = vsel %vm2672_vm3, %v1343_v44, -1e+30  ;;  %v1989_v47 = vpop.f32.mrb[29].mxu0 }
 0xb64   :  { %v1349_v48 = vsel %vm2672_vm3, %v1291_v45, -1e+30  ;;  %v1983_v49 = vpop.f32.mrb[25].mxu1  ;;  %v1346_v50 = vpop.f32.mrb[30].mxu0  ;;  %v1354_v51 = vsel %vm226_vm2, %v1350_v46, -inf }
 0xb65   :  { %v1294_v52 = vpop.f32.mrb[26].mxu1  ;;  %v1351_v53 = vsel %vm226_vm2, %v1349_v48, -inf  ;;  %1355 = vmax.xlane.f32.xlu0 %v1354_v51  ;;  %v1990_v54 = vpop.f32.mrb[31].mxu0 }
 0xb66   :  { %1352 = vmax.xlane.f32.xlu1 %v1351_v53  ;;  %v1984_v55 = vpop.f32.mrb[27].mxu1 }
 0xbf2   :  { %v1356_v60 = vpop.xlane.xlu0 %1355 }
 0xbf3   :  { %v1353_v61 = vpop.xlane.xlu1 %1352  ;;  %v1358_v62 = vsub.f32 %v1350_v46, %v1356_v60 }
 0xbf4   :  { %v1357_v63 = vsub.f32 %v1349_v48, %v1353_v61  ;;  %v2142_v48 = vld [vmem:[#allocation2] sm:$0xff]  }
 0xbf5   :  { %v1361_v1 = vmul.f32 1.442695, %v1358_v62  ;;  %v150_v17 = vunpack.c.l.bf16 %v2142_v48  ;;  %v151_v52 = vunpack.c.h.bf16 %v2142_v48 }
 0xbf6   :  { %v1359_v2 = vmul.f32 1.442695, %v1357_v63 }
 0xbf7   :  { %2126 = vpow2.f32 %v1361_v1 }
 0xbf8   :  { %2128 = vpow2.f32 %v1359_v2 }
 0xc01   :  { %v2127_v35 = vpop.eup %2126 }
 0xc02   :  { %v2129_v8 = vpop.eup %2128  ;;  %v1366_v9 = vsel %vm226_vm2, %v2127_v35, 0.0 }
 0xc03   :  { %v1363_v12 = vsel %vm226_vm2, %v2129_v8, 0.0  ;;  %1367 = vadd.xlane.f32.xlu1 %v1366_v9 }
 0xc04   :  { %1364 = vadd.xlane.f32.xlu0 %v1363_v12 }
 0xc14   :  { %1423 = vrot.lane.b32.xlu1 %v2688_v56, %s2397_s14 }
 0xc18   :  { %1475 = vrot.lane.b32.xlu1 %v843_v15, %s2398_s5 }
 0xc1a   :  { %1375 = vrot.lane.b32.xlu0 %v2694_v57, %s2397_s14 }
 0xc1c   :  { %1481 = vrot.lane.b32.xlu1 %v1157_v6, %s2399_s15 }
 0xc1e   :  { %1477 = vrot.lane.b32.xlu0 %v844_v16, %s2398_s5 }
 0xc22   :  { %1483 = vrot.lane.b32.xlu0 %v1158_v19, %s2399_s15 }
 0xc90   :  { %v1368_v20 = vpop.xlane.xlu1 %1367 }
 0xc91   :  { %2130 = vrcp.f32 %v1368_v20  ;;  %v1365_v21 = vpop.xlane.xlu0 %1364  ;;  %v2063_v20 = vld [vmem:[#allocation11] sm:$0xff]  }
 0xc92   :  { %2132 = vrcp.f32 %v1365_v21  ;;  %v2064_v21 = vld [vmem:[#allocation11 + $0x8] sm:$0xff]  }
 0xc94   :  { %v1424_v56 = vpop.permute.xlu1 %1423 }
 0xc95   :  { %v1429_v10 = vsel %vm436_vm4, %v1424_v56, 0  ;;  %v1376_v24 = vpop.permute.xlu0 %1375  ;;  %v2065_v56 = vld [vmem:[#allocation14] sm:$0xff]  }
 0xc96   :  { %v1381_v25 = vsel %vm436_vm4, %v1376_v24, 0  ;;  %1998 = vmatpush3.bf16.msra.mxu0 %v1429_v10  ;;  %v2066_v10 = vld [vmem:[#allocation14 + $0x8] sm:$0xff]  }
 0xc97   :  { %1992 = vmatpush3.bf16.msra.mxu1 %v1381_v25  ;;  %2011 = vmatprep.subr.bf16.mxu0 %v2386_v0 }
 0xc98   :  { %2003 = vmatprep.subr.bf16.mxu1 %v2386_v0  ;;  %v1476_v38 = vpop.permute.xlu1 %1475 }
 0xc99   :  { %v1478_v14 = vpop.permute.xlu0 %1477  ;;  %v1493_v28 = vsel %vm226_vm2, %v529_v18, %v1476_v38 }
 0xc9a   :  { %v1496_v22 = vsel %vm226_vm2, %v530_v40, %v1478_v14  ;;  %v1847_v40 = vld [vmem:[#allocation16] ss:$0 sm:$0xff] }
 0xc9b   :  { %v2131_v57 = vpop.eup %2130 }
 0xc9c   :  { %v2133_v11 = vpop.eup %2132  ;;  %v1372_v26 = vmul.f32 %v2131_v57, %v2127_v35  ;;  %v1482_v41 = vpop.permute.xlu1 %1481 }
 0xc9d   :  { %v1371_v27 = vmul.f32 %v2133_v11, %v2129_v8  ;;  %v1484_v39 = vpop.permute.xlu0 %1483  ;;  %v1499_v43 = vsel %vm1497_vm5, %v1493_v28, %v1482_v41 }
 0xc9e   :  { %v1374_v30 = vpack.c.bf16 %v1372_v26, %v1372_v26  ;;  %v1501_v29 = vsel %vm1497_vm5, %v1496_v22, %v1484_v39 }
 0xc9f   :  { %v1373_v31 = vpack.c.bf16 %v1371_v27, %v1371_v27 }
 0xca0   :  { %2000 = vmatmul.mubr.msk.bf16.vlgmr.msra.gmra.mrb[32].mxu0 %vm226_vm2, %v1374_v30 }
 0xca1   :  { %1994 = vmatmul.mubr.msk.bf16.vlgmr.msra.gmra.mrb[28].mxu1 %vm226_vm2, %v1373_v31  ;;  %2015 = vmatprep.mubr.msk.bf16.mxu0 %vm2387_vm0, %v2386_v0 }
 0xca2   :  { %2007 = vmatprep.mubr.msk.bf16.mxu1 %vm2387_vm0, %v2386_v0  ;;  %2004 = vmatpush3.bf16.msra.mxu1 %v2061_v32 }
 0xca3   :  { %2005 = vmatprep.subr.bf16.mxu1 %v2386_v0  ;;  %2012 = vmatpush3.bf16.msra.mxu0 %v2063_v20 }
 0xca4   :  { %2013 = vmatprep.subr.bf16.mxu0 %v2386_v0 }
 0xca6   :  { %2006 = vmatpush3.bf16.msra.mxu1 %v2062_v58 }
 0xca7   :  { %2019 = vmatprep.subr.bf16.mxu1 %v2386_v0  ;;  %2014 = vmatpush3.bf16.msra.mxu0 %v2064_v21 }
 0xd73   :  { %v1465_v59 = vpop.f32.mrb[32].mxu0 }
 0xd74   :  { %v1417_v33 = vpop.f32.mrb[28].mxu1  ;;  %v1472_v34 = vpack.c.bf16 %v1465_v59, %v1465_v59  ;;  %v2001_v36 = vpop.f32.mrb[33].mxu0 }
 0xd75   :  { %v1471_v37 = vpack.c.bf16 %v1417_v33, %v1417_v33  ;;  %v1995_v3 = vpop.f32.mrb[29].mxu1  ;;  %v1468_v5 = vpop.f32.mrb[34].mxu0  ;;  %v2067_v33 = vld [vmem:[#allocation14 + $0x10] sm:$0xff]   ;;  %v1843_v36 = vld [vmem:[#allocation13] ss:$0 sm:$0xff] }
 0xd76   :  { %v1420_v7 = vpop.f32.mrb[30].mxu1  ;;  %1489 = vrot.lane.b32.xlu0 %v1472_v34, %s2400_s0  ;;  %v2002_v4 = vpop.f32.mrb[35].mxu0  ;;  %v2068_v34 = vld [vmem:[#allocation14 + $0x18] sm:$0xff]  }
 0xd77   :  { %1487 = vrot.lane.b32.xlu1 %v1471_v37, %s2400_s0  ;;  %v1996_v13 = vpop.f32.mrb[31].mxu1 }
 0xde8   :  { %v1490_v42 = vpop.permute.xlu0 %1489 }
 0xde9   :  { %v1488_v44 = vpop.permute.xlu1 %1487  ;;  %v1506_v45 = vsel %vm1502_vm6, %v1501_v29, %v1490_v42 }
 0xdea   :  { %v1504_v46 = vsel %vm1502_vm6, %v1499_v43, %v1488_v44 }
 0xdeb   :  { %v1839_v47 = vcombine.low %v1504_v46, %v1506_v45 }
 0xded   :  { %2008 = vmatmul.mubr.msk.bf16.vlgmr.msra.gmra.mrb[32].mxu1 %vm176_vm1, %v1839_v47 }
 0xdee   :  { %2027 = vmatprep.mubr.msk.bf16.mxu1 %vm2387_vm0, %v2386_v0  ;;  %2020 = vmatpush3.bf16.msra.mxu1 %v2065_v56 }
 0xdef   :  { %2021 = vmatprep.subr.bf16.mxu1 %v2386_v0 }
 0xdf2   :  { %2022 = vmatpush3.bf16.msra.mxu1 %v2066_v10 }
 0xdf3   :  { %2023 = vmatprep.subr.bf16.mxu1 %v2386_v0 }
 0xdf6   :  { %2024 = vmatpush3.bf16.msra.mxu1 %v2067_v33 }
 0xdf7   :  { %2025 = vmatprep.subr.bf16.mxu1 %v2386_v0 }
 0xdfa   :  { %2026 = vmatpush3.bf16.msra.mxu1 %v2068_v34 }
 0xec0   :  { %v1572_v49 = vpop.f32.mrb[32].mxu1 }
 0xec1   :  { %v1573_v50 = vadd.f32 %v1838_v23, %v1572_v49  ;;  %v2009_v51 = vpop.f32.mrb[33].mxu1 }
 0xec2   :  { %v1575_v53 = vpop.f32.mrb[34].mxu1 }
 0xec3   :  { %v1579_v54 = vadd.f32 %v1573_v50, %v150_v17  ;;  %v1576_v55 = vadd.f32 %v1838_v23, %v1575_v53  ;;  %v2010_v60 = vpop.f32.mrb[35].mxu1 }
 0xec5   :  { %v1580_v61 = vadd.f32 %v1576_v55, %v151_v52  ;;  %v1581_v62 = vsel %vm176_vm1, %v1579_v54, 0.0 }
 0xec6   :  { %1582 = vadd.xlane.f32.xlu1 %v1581_v62 }
 0xec7   :  { %v1584_v63 = vsel %vm176_vm1, %v1580_v61, 0.0 }
 0xec8   :  { %1585 = vadd.xlane.f32.xlu0 %v1584_v63 }
 0xf53   :  { %v1583_v1 = vpop.xlane.xlu1 %1582 }
 0xf54   :  { %v1588_v2 = vmul.f32 0.03125, %v1583_v1 }
 0xf55   :  { %v1586_v35 = vpop.xlane.xlu0 %1585 }
 0xf56   :  { %v1590_v8 = vsub.f32 %v1579_v54, %v1588_v2  ;;  %v1589_v9 = vmul.f32 0.03125, %v1586_v35 }
 0xf58   :  { %v1591_v12 = vsub.f32 %v1580_v61, %v1589_v9  ;;  %v1592_v15 = vmul.f32 %v1590_v8, %v1590_v8 }
 0xf5a   :  { %v1594_v6 = vsel %vm176_vm1, %v1592_v15, 0.0  ;;  %v1593_v16 = vmul.f32 %v1591_v12, %v1591_v12 }
 0xf5b   :  { %1595 = vadd.xlane.f32.xlu0 %v1594_v6 }
 0xf5c   :  { %v1597_v19 = vsel %vm176_vm1, %v1593_v16, 0.0 }
 0xf5d   :  { %1598 = vadd.xlane.f32.xlu1 %v1597_v19 }
 0xfe8   :  { %v1596_v24 = vpop.xlane.xlu0 %1595 }
 0xfe9   :  { %v1600_v25 = vmul.f32 0.03125, %v1596_v24 }
 0xfea   :  { %v1599_v57 = vpop.xlane.xlu1 %1598 }
 0xfeb   :  { %v1602_v11 = vadd.f32 1e-05, %v1600_v25  ;;  %v1601_v26 = vmul.f32 0.03125, %v1599_v57 }
 0xfed   :  { %2134 = vrsqrt.f32 %v1602_v11  ;;  %v1603_v27 = vadd.f32 1e-05, %v1601_v26 }
 0xfef   :  { %2136 = vrsqrt.f32 %v1603_v27 }
 0xff7   :  { %v2135_v30 = vpop.eup %2134 }
 0xff8   :  { %v1606_v32 = vmul.f32 %v2135_v30, %v1590_v8 }
 0xff9   :  { %v2137_v31 = vpop.eup %2136 }
 0xffa   :  { %v1607_v58 = vmul.f32 %v2137_v31, %v1591_v12 }
 0xffc   :  { %v1608_v59 = vpack.c.bf16 %v1607_v58, %v1606_v32 }
 0xffe   :  { %2016 = vmatmul.mubr.msk.bf16.vlgmr.msra.gmra.mrb[36].mxu0 %vm176_vm1, %v1608_v59 }
0x10d1   :  { %v1669_v37 = vpop.f32.mrb[36].mxu0 }
0x10d2   :  { %v1670_v3 = vadd.f32 %v1843_v36, %v1669_v37  ;;  %v2017_v5 = vpop.f32.mrb[37].mxu0 }
0x10d3   :  { %v1672_v7 = vpop.f32.mrb[38].mxu0 }
0x10d4   :  { %v1673_v4 = vadd.f32 %v1843_v36, %v1672_v7  ;;  %v2018_v13 = vpop.f32.mrb[39].mxu0  ;;  %v1676_v14 = vmax.f32 %v1670_v3, 0.0 }
0x10d6   :  { %v1677_v38 = vmax.f32 %v1673_v4, 0.0 }
0x10d8   :  { %v1678_v39 = vpack.c.bf16 %v1677_v38, %v1676_v14 }
0x10da   :  { %2028 = vmatmul.mubr.msk.bf16.vlgmr.msra.gmra.mrb[36].mxu1 %vm1718_vm7, %v1678_v39 }
0x11ad   :  { %v1756_v41 = vpop.f32.mrb[36].mxu1 }
0x11ae   :  { %v1757_v18 = vadd.f32 %v1847_v40, %v1756_v41  ;;  %v2029_v22 = vpop.f32.mrb[37].mxu1 }
0x11af   :  { %v1759_v28 = vpop.f32.mrb[38].mxu1 }
0x11b0   :  { %v1763_v0 = vadd.f32 %v1757_v18, %v1606_v32  ;;  %v1760_v29 = vadd.f32 %v1847_v40, %v1759_v28  ;;  %v2030_v42 = vpop.f32.mrb[39].mxu1 }
0x11b2   :  { %v1764_v43 = vadd.f32 %v1760_v29, %v1607_v58  ;;  %v1765_v44 = vsel %vm176_vm1, %v1763_v0, 0.0 }
0x11b3   :  { %1766 = vadd.xlane.f32.xlu0 %v1765_v44 }
0x11b4   :  { %v1768_v45 = vsel %vm176_vm1, %v1764_v43, 0.0 }
0x11b5   :  { %1769 = vadd.xlane.f32.xlu1 %v1768_v45 }
0x1240   :  { %v1767_v46 = vpop.xlane.xlu0 %1766 }
0x1241   :  { %v1771_v47 = vmul.f32 0.03125, %v1767_v46 }
0x1242   :  { %v1770_v23 = vpop.xlane.xlu1 %1769 }
0x1243   :  { %v1773_v48 = vsub.f32 %v1763_v0, %v1771_v47  ;;  %v1772_v17 = vmul.f32 0.03125, %v1770_v23 }
0x1245   :  { %v1774_v49 = vsub.f32 %v1764_v43, %v1772_v17  ;;  %v1775_v50 = vmul.f32 %v1773_v48, %v1773_v48 }
0x1247   :  { %v1777_v51 = vsel %vm176_vm1, %v1775_v50, 0.0  ;;  %v1776_v52 = vmul.f32 %v1774_v49, %v1774_v49 }
0x1248   :  { %1778 = vadd.xlane.f32.xlu0 %v1777_v51 }
0x1249   :  { %v1780_v53 = vsel %vm176_vm1, %v1776_v52, 0.0 }
0x124a   :  { %1781 = vadd.xlane.f32.xlu1 %v1780_v53 }
0x12d5   :  { %v1779_v54 = vpop.xlane.xlu0 %1778 }
0x12d6   :  { %v1783_v55 = vmul.f32 0.03125, %v1779_v54 }
0x12d7   :  { %v1782_v60 = vpop.xlane.xlu1 %1781 }
0x12d8   :  { %v1785_v61 = vadd.f32 1e-05, %v1783_v55  ;;  %v1784_v62 = vmul.f32 0.03125, %v1782_v60 }
0x12da   :  { %2138 = vrsqrt.f32 %v1785_v61  ;;  %v1786_v63 = vadd.f32 1e-05, %v1784_v62 }
0x12dc   :  { %2140 = vrsqrt.f32 %v1786_v63 }
0x12e4   :  { %v2139_v1 = vpop.eup %2138 }
0x12e5   :  { %v1789_v2 = vmul.f32 %v2139_v1, %v1773_v48 }
0x12e6   :  { %v2141_v35 = vpop.eup %2140 }
0x12e7   :  { %v1790_v8 = vmul.f32 %v2141_v35, %v1774_v49  ;;  %v1791_v9 = vpack.c.bf16 %v1789_v2, %v1789_v2 }
0x12e9   :  { %v1792_v12 = vpack.c.bf16 %v1790_v8, %v1790_v8  ;;  %1794 = vst.msk [vmem:[#allocation17] sm:$0xf] %vm1793_vm8, %v1791_v9 }
0x12eb   :  { %1795 = vst.msk [vmem:[#allocation17 + $0x4] sm:$0xf] %vm1793_vm8, %v1792_v12 }
0x12ec   :  { %2352 = shalt.err (!%p2349_p6)
}
0x12ed   :  { %s2353_s25 = scalar_lea.hbm %s2964_s9, 128 }
0x12ee   :  { %p2354_p7 = scmp.ne.s32.totalorder %s2964_s9, %s2353_s25  ;;  %p2357_p8 = scmp.lt.u32.totalorder %s2353_s25, %s2964_s9 }
0x12f0   :  { %p2359_p9 = pnand %p2357_p8, %p2354_p7 }
0x12f2   :  { %2362 = shalt.err (!%p2359_p9)
}
0x12f3   :  { %1807 = dma.vmem_to_hbm [thread:$0]  %s1802_s16, 128, %s2964_s9, [#allocation4], %s2377_s21, %s2377_s21, %s2378_s22  }
0x12f4   :  { %2373 = dma.done.wait [#allocation4], 128  }
0x12f5   :  { %2374 = vsyncadd [#allocation4], 4294967168 }
0x12f6   :  { %1811 = vsyncpa [#allocation3], 1 }
0x12f7   :  { %1812 = vsyncpa [#allocation6], 1 }
0x12f8   :  { %1813 = vsyncpa [#allocation9], 1 }
0x12f9   :  { %1814 = vsyncpa [#allocation12], 1 }
0x12fa   :  { %1815 = vsyncpa [#allocation15], 1 }
0x12fb   :  { %1816 = vsyncpa [#allocation4], 1 }

</bundles_post_ra>
